<compile_context>
chip_gen: v6e
topology: v6e:2x2x1
jax: 0.10.0
libtpu: 0.0.40
codegen_flags: <defaults>
</compile_context>

<pallas_src>
import math
import functools

import jax
import jax.numpy as jnp
from jax.experimental import pallas as pl
from jax.experimental.pallas import tpu as pltpu


def cross_attention_kernel(
    q_ref, k_ref, v_ref,
    wq_ref, bq_ref, wk_ref, bk_ref, wv_ref, bv_ref, wo_ref, bo_ref,
    o_ref,
    *, num_heads: int, head_dim: int,
):
    TB, S, D = q_ref.shape
    inv_scale = 1.0 / math.sqrt(head_dim)

    # Flatten (TB, S) -> rows so each projection is one big MXU matmul.
    xq = q_ref[...].reshape(TB * S, D)
    xk = k_ref[...].reshape(TB * S, D)
    xv = v_ref[...].reshape(TB * S, D)

    q = (jnp.dot(xq, wq_ref[...], preferred_element_type=jnp.float32)
         + bq_ref[...]).reshape(TB, S, D)
    k = (jnp.dot(xk, wk_ref[...], preferred_element_type=jnp.float32)
         + bk_ref[...]).reshape(TB, S, D)
    v = (jnp.dot(xv, wv_ref[...], preferred_element_type=jnp.float32)
         + bv_ref[...]).reshape(TB, S, D)

    # Per-head scaled dot-product attention.  Heads are unrolled and sliced on
    # the lane axis, avoiding a (TB, S, H, hd) relayout/transpose.
    out_heads = []
    for h in range(num_heads):
        sl = slice(h * head_dim, (h + 1) * head_dim)
        qh = q[:, :, sl]                                    # (TB, S, hd)
        kh = k[:, :, sl]
        vh = v[:, :, sl]
        s_h = jnp.einsum("bqd,bkd->bqk", qh, kh,
                         preferred_element_type=jnp.float32) * inv_scale
        # TODO(synk): optional attention mask not implemented (mask=None path).
        m = jnp.max(s_h, axis=-1, keepdims=True)
        p = jnp.exp(s_h - m)
        w = p / jnp.sum(p, axis=-1, keepdims=True)          # softmax over keys
        # TODO(synk): dropout on attention weights is identity at inference.
        out_heads.append(jnp.einsum("bqk,bkd->bqd", w, vh,
                                    preferred_element_type=jnp.float32))
    attn = jnp.concatenate(out_heads, axis=-1).reshape(TB * S, D)

    out = jnp.dot(attn, wo_ref[...], preferred_element_type=jnp.float32) + bo_ref[...]
    o_ref[...] = out.reshape(TB, S, D)


def _pick_batch_tile(B: int, S: int) -> int:
    """Largest batch tile with ~<=512 rows per grid step that divides B.
    Prefer a grid of length >= 2 so v7x megacore can shard the grid."""
    cap = max(1, 512 // max(S, 1))
    tb = 1
    for c in range(1, B + 1):
        if B % c == 0 and c <= cap:
            tb = c
    if tb == B and B % 2 == 0 and B >= 2:
        tb = B // 2
    return tb


def cross_attention_forward(query, key, value, params, *, num_heads: int, tb=None):
    """query/key/value: (B, S, D) float32.  params: dict (see init_params)."""
    B, S, D = query.shape
    assert D % num_heads == 0
    head_dim = D // num_heads
    if tb is None:
        tb = _pick_batch_tile(B, S)
    assert B % tb == 0, "batch must be divisible by the batch tile"

    kernel = functools.partial(cross_attention_kernel,
                               num_heads=num_heads, head_dim=head_dim)

    seq_spec = pl.BlockSpec((tb, S, D), lambda i: (i, 0, 0))
    mat_spec = pl.BlockSpec((D, D), lambda i: (0, 0))   # constant across grid
    vec_spec = pl.BlockSpec((1, D), lambda i: (0, 0))   # -> DMA'd only once

    return pl.pallas_call(
        kernel,
        out_shape=jax.ShapeDtypeStruct((B, S, D), jnp.float32),
        grid_spec=pltpu.PrefetchScalarGridSpec(
            num_scalar_prefetch=0,
            grid=(B // tb,),
            in_specs=[
                seq_spec, seq_spec, seq_spec,       # query, key, value
                mat_spec, vec_spec,                 # Wq^T, bq
                mat_spec, vec_spec,                 # Wk^T, bk
                mat_spec, vec_spec,                 # Wv^T, bv
                mat_spec, vec_spec,                 # Wo^T, bo
            ],
            out_specs=seq_spec,
        ),
        compiler_params=pltpu.CompilerParams(
            dimension_semantics=("parallel",),
            vmem_limit_bytes=32 * 1024 * 1024,
        ),
    )(
        query, key, value,
        params["wq_t"], params["bq"],
        params["wk_t"], params["bk"],
        params["wv_t"], params["bv"],
        params["wo_t"], params["bo"],
    )


def init_params(key, dim: int):
    """Deterministic synthetic init. Linear weights stored pre-transposed (in, out)."""
    D = dim
    ks = jax.random.split(key, 8)
    std = 1.0 / math.sqrt(D)

    def lin(kw, kb):
        w = jax.random.uniform(kw, (D, D), jnp.float32, -std, std)   # torch (out, in)
        b = jax.random.uniform(kb, (1, D), jnp.float32, -std, std)
        return w.T, b   # kernel does x @ W^T + b == torch Linear

    wq_t, bq = lin(ks[0], ks[1])
    wk_t, bk = lin(ks[2], ks[3])
    wv_t, bv = lin(ks[4], ks[5])
    wo_t, bo = lin(ks[6], ks[7])
    return dict(wq_t=wq_t, bq=bq, wk_t=wk_t, bk=bk,
                wv_t=wv_t, bv=bv, wo_t=wo_t, bo=bo)


def cross_attention_ref(query, key, value, params, *, num_heads: int):
    """Pure-JAX reference mirroring the PyTorch forward (eval mode, mask=None)."""
    B, S, D = query.shape
    hd = D // num_heads
    q = query @ params["wq_t"] + params["bq"]
    k = key @ params["wk_t"] + params["bk"]
    v = value @ params["wv_t"] + params["bv"]
    qh = q.reshape(B, S, num_heads, hd).transpose(0, 2, 1, 3)
    kh = k.reshape(B, S, num_heads, hd).transpose(0, 2, 1, 3)
    vh = v.reshape(B, S, num_heads, hd).transpose(0, 2, 1, 3)
    scores = (qh @ kh.transpose(0, 1, 3, 2)) / math.sqrt(hd)
    w = jax.nn.softmax(scores, axis=-1)
    o = (w @ vh).transpose(0, 2, 1, 3).reshape(B, S, D)
    return o @ params["wo_t"] + params["bo"]


if __name__ == "__main__":
    B, S, DIM, HEADS = 4, 8, 128, 8

    root = jax.random.PRNGKey(0)
    kq, kk, kv, kp = jax.random.split(root, 4)
    query = jax.random.normal(kq, (B, S, DIM), dtype=jnp.float32)
    key_in = jax.random.normal(kk, (B, S, DIM), dtype=jnp.float32)
    value = jax.random.normal(kv, (B, S, DIM), dtype=jnp.float32)
    params = init_params(kp, DIM)

    out = cross_attention_forward(query, key_in, value, params, num_heads=HEADS)
    out = jax.block_until_ready(out)

    ref = cross_attention_ref(query, key_in, value, params, num_heads=HEADS)
    assert out.shape == (B, S, DIM)
    assert jnp.allclose(out, ref, atol=1e-4, rtol=1e-4), "mismatch vs reference"

    print("KERNEL_OK")
</pallas_src>

<mosaic_0001>
module attributes {stable_mosaic.version = 11 : i64} {
  func.func @cross_attention_kernel(%arg0: i32, %arg1: memref<2x8x128xf32, #tpu.memory_space<vmem>>, %arg2: memref<2x8x128xf32, #tpu.memory_space<vmem>>, %arg3: memref<2x8x128xf32, #tpu.memory_space<vmem>>, %arg4: memref<128x128xf32, #tpu.memory_space<vmem>>, %arg5: memref<1x128xf32, #tpu.memory_space<vmem>>, %arg6: memref<128x128xf32, #tpu.memory_space<vmem>>, %arg7: memref<1x128xf32, #tpu.memory_space<vmem>>, %arg8: memref<128x128xf32, #tpu.memory_space<vmem>>, %arg9: memref<1x128xf32, #tpu.memory_space<vmem>>, %arg10: memref<128x128xf32, #tpu.memory_space<vmem>>, %arg11: memref<1x128xf32, #tpu.memory_space<vmem>>, %arg12: memref<2x8x128xf32, #tpu.memory_space<vmem>>) attributes {dimension_semantics = [#tpu.dimension_semantics<parallel>], iteration_bounds = array<i64: 2>, scalar_prefetch = 0 : i64, scratch_operands = 0 : i64, tpu.core_type = #tpu.core_type<tc>, window_params = [{transform_indices = @transform_0, window_bounds = array<i64: 2, 8, 128>}, {transform_indices = @transform_1, window_bounds = array<i64: 2, 8, 128>}, {transform_indices = @transform_2, window_bounds = array<i64: 2, 8, 128>}, {pipeline_mode = #tpu.pipeline_mode<synchronous>, transform_indices = @transform_3, window_bounds = array<i64: 128, 128>}, {pipeline_mode = #tpu.pipeline_mode<synchronous>, transform_indices = @transform_4, window_bounds = array<i64: 1, 128>}, {pipeline_mode = #tpu.pipeline_mode<synchronous>, transform_indices = @transform_5, window_bounds = array<i64: 128, 128>}, {pipeline_mode = #tpu.pipeline_mode<synchronous>, transform_indices = @transform_6, window_bounds = array<i64: 1, 128>}, {pipeline_mode = #tpu.pipeline_mode<synchronous>, transform_indices = @transform_7, window_bounds = array<i64: 128, 128>}, {pipeline_mode = #tpu.pipeline_mode<synchronous>, transform_indices = @transform_8, window_bounds = array<i64: 1, 128>}, {pipeline_mode = #tpu.pipeline_mode<synchronous>, transform_indices = @transform_9, window_bounds = array<i64: 128, 128>}, {pipeline_mode = #tpu.pipeline_mode<synchronous>, transform_indices = @transform_10, window_bounds = array<i64: 1, 128>}, {transform_indices = @transform_11, window_bounds = array<i64: 2, 8, 128>}]} {
    %c0 = arith.constant 0 : index
    %c0_0 = arith.constant 0 : index
    %c0_1 = arith.constant 0 : index
    %0 = vector.load %arg1[%c0, %c0_0, %c0_1] : memref<2x8x128xf32, #tpu.memory_space<vmem>>, vector<2x8x128xf32>
    %1 = vector.shape_cast %0 : vector<2x8x128xf32> to vector<16x128xf32>
    %c0_2 = arith.constant 0 : index
    %c0_3 = arith.constant 0 : index
    %c0_4 = arith.constant 0 : index
    %2 = vector.load %arg2[%c0_2, %c0_3, %c0_4] : memref<2x8x128xf32, #tpu.memory_space<vmem>>, vector<2x8x128xf32>
    %3 = vector.shape_cast %2 : vector<2x8x128xf32> to vector<16x128xf32>
    %c0_5 = arith.constant 0 : index
    %c0_6 = arith.constant 0 : index
    %c0_7 = arith.constant 0 : index
    %4 = vector.load %arg3[%c0_5, %c0_6, %c0_7] : memref<2x8x128xf32, #tpu.memory_space<vmem>>, vector<2x8x128xf32>
    %5 = vector.shape_cast %4 : vector<2x8x128xf32> to vector<16x128xf32>
    %c0_8 = arith.constant 0 : index
    %c0_9 = arith.constant 0 : index
    %6 = vector.load %arg4[%c0_8, %c0_9] : memref<128x128xf32, #tpu.memory_space<vmem>>, vector<128x128xf32>
    %cst = arith.constant dense<0.000000e+00> : vector<16x128xf32>
    %7 = tpu.matmul %1, %6, %cst {dimension_numbers = #tpu.dot_dimension_numbers<[1], [0], [0], [1], [0, 0, 1, 1], [], []>} : vector<16x128xf32>, vector<128x128xf32>, vector<16x128xf32> -> vector<16x128xf32>
    %c0_10 = arith.constant 0 : index
    %c0_11 = arith.constant 0 : index
    %8 = vector.load %arg5[%c0_10, %c0_11] : memref<1x128xf32, #tpu.memory_space<vmem>>, vector<1x128xf32>
    %9 = vector.broadcast %8 : vector<1x128xf32> to vector<16x128xf32>
    %10 = arith.addf %7, %9 : vector<16x128xf32>
    %11 = vector.shape_cast %10 : vector<16x128xf32> to vector<2x8x128xf32>
    %c0_12 = arith.constant 0 : index
    %c0_13 = arith.constant 0 : index
    %12 = vector.load %arg6[%c0_12, %c0_13] : memref<128x128xf32, #tpu.memory_space<vmem>>, vector<128x128xf32>
    %cst_14 = arith.constant dense<0.000000e+00> : vector<16x128xf32>
    %13 = tpu.matmul %3, %12, %cst_14 {dimension_numbers = #tpu.dot_dimension_numbers<[1], [0], [0], [1], [0, 0, 1, 1], [], []>} : vector<16x128xf32>, vector<128x128xf32>, vector<16x128xf32> -> vector<16x128xf32>
    %c0_15 = arith.constant 0 : index
    %c0_16 = arith.constant 0 : index
    %14 = vector.load %arg7[%c0_15, %c0_16] : memref<1x128xf32, #tpu.memory_space<vmem>>, vector<1x128xf32>
    %15 = vector.broadcast %14 : vector<1x128xf32> to vector<16x128xf32>
    %16 = arith.addf %13, %15 : vector<16x128xf32>
    %17 = vector.shape_cast %16 : vector<16x128xf32> to vector<2x8x128xf32>
    %c0_17 = arith.constant 0 : index
    %c0_18 = arith.constant 0 : index
    %18 = vector.load %arg8[%c0_17, %c0_18] : memref<128x128xf32, #tpu.memory_space<vmem>>, vector<128x128xf32>
    %cst_19 = arith.constant dense<0.000000e+00> : vector<16x128xf32>
    %19 = tpu.matmul %5, %18, %cst_19 {dimension_numbers = #tpu.dot_dimension_numbers<[1], [0], [0], [1], [0, 0, 1, 1], [], []>} : vector<16x128xf32>, vector<128x128xf32>, vector<16x128xf32> -> vector<16x128xf32>
    %c0_20 = arith.constant 0 : index
    %c0_21 = arith.constant 0 : index
    %20 = vector.load %arg9[%c0_20, %c0_21] : memref<1x128xf32, #tpu.memory_space<vmem>>, vector<1x128xf32>
    %21 = vector.broadcast %20 : vector<1x128xf32> to vector<16x128xf32>
    %22 = arith.addf %19, %21 : vector<16x128xf32>
    %23 = vector.shape_cast %22 : vector<16x128xf32> to vector<2x8x128xf32>
    %24 = vector.extract_strided_slice %11 {offsets = [0, 0, 0], sizes = [2, 8, 16], strides = [1, 1, 1]} : vector<2x8x128xf32> to vector<2x8x16xf32>
    %25 = vector.extract_strided_slice %17 {offsets = [0, 0, 0], sizes = [2, 8, 16], strides = [1, 1, 1]} : vector<2x8x128xf32> to vector<2x8x16xf32>
    %26 = vector.extract_strided_slice %23 {offsets = [0, 0, 0], sizes = [2, 8, 16], strides = [1, 1, 1]} : vector<2x8x128xf32> to vector<2x8x16xf32>
    "tpu.trace_start"() <{level = 10 : i32, message = "bqd,bkd->bqk"}> : () -> ()
    %cst_22 = arith.constant dense<0.000000e+00> : vector<2x8x8xf32>
    %27 = tpu.matmul %24, %25, %cst_22 {dimension_numbers = #tpu.dot_dimension_numbers<[2], [2], [1], [1], [0, 0, 0, 1, 1, 1], [0], [0]>} : vector<2x8x16xf32>, vector<2x8x16xf32>, vector<2x8x8xf32> -> vector<2x8x8xf32>
    "tpu.trace_stop"() : () -> ()
    %cst_23 = arith.constant 2.500000e-01 : f32
    %28 = vector.broadcast %cst_23 : f32 to vector<2x8x8xf32>
    %29 = arith.mulf %27, %28 : vector<2x8x8xf32>
    %cst_24 = arith.constant dense<0xFF800000> : vector<2x8xf32>
    %30 = vector.multi_reduction <maximumf>, %29, %cst_24 [2] : vector<2x8x8xf32> to vector<2x8xf32>
    %31 = vector.shape_cast %30 : vector<2x8xf32> to vector<2x8x1xf32>
    %32 = vector.broadcast %31 : vector<2x8x1xf32> to vector<2x8x8xf32>
    %33 = arith.subf %29, %32 : vector<2x8x8xf32>
    %34 = math.exp %33 : vector<2x8x8xf32>
    %cst_25 = arith.constant dense<0.000000e+00> : vector<2x8xf32>
    %35 = vector.multi_reduction <add>, %34, %cst_25 [2] : vector<2x8x8xf32> to vector<2x8xf32>
    %36 = vector.shape_cast %35 : vector<2x8xf32> to vector<2x8x1xf32>
    %37 = vector.broadcast %36 : vector<2x8x1xf32> to vector<2x8x8xf32>
    %38 = arith.divf %34, %37 : vector<2x8x8xf32>
    "tpu.trace_start"() <{level = 10 : i32, message = "bqk,bkd->bqd"}> : () -> ()
    %cst_26 = arith.constant dense<0.000000e+00> : vector<2x8x16xf32>
    %39 = tpu.matmul %38, %26, %cst_26 {dimension_numbers = #tpu.dot_dimension_numbers<[2], [1], [1], [2], [0, 0, 0, 1, 1, 2], [0], [0]>} : vector<2x8x8xf32>, vector<2x8x16xf32>, vector<2x8x16xf32> -> vector<2x8x16xf32>
    "tpu.trace_stop"() : () -> ()
    %40 = vector.extract_strided_slice %11 {offsets = [0, 0, 16], sizes = [2, 8, 16], strides = [1, 1, 1]} : vector<2x8x128xf32> to vector<2x8x16xf32>
    %41 = vector.extract_strided_slice %17 {offsets = [0, 0, 16], sizes = [2, 8, 16], strides = [1, 1, 1]} : vector<2x8x128xf32> to vector<2x8x16xf32>
    %42 = vector.extract_strided_slice %23 {offsets = [0, 0, 16], sizes = [2, 8, 16], strides = [1, 1, 1]} : vector<2x8x128xf32> to vector<2x8x16xf32>
    "tpu.trace_start"() <{level = 10 : i32, message = "bqd,bkd->bqk"}> : () -> ()
    %cst_27 = arith.constant dense<0.000000e+00> : vector<2x8x8xf32>
    %43 = tpu.matmul %40, %41, %cst_27 {dimension_numbers = #tpu.dot_dimension_numbers<[2], [2], [1], [1], [0, 0, 0, 1, 1, 1], [0], [0]>} : vector<2x8x16xf32>, vector<2x8x16xf32>, vector<2x8x8xf32> -> vector<2x8x8xf32>
    "tpu.trace_stop"() : () -> ()
    %cst_28 = arith.constant 2.500000e-01 : f32
    %44 = vector.broadcast %cst_28 : f32 to vector<2x8x8xf32>
    %45 = arith.mulf %43, %44 : vector<2x8x8xf32>
    %cst_29 = arith.constant dense<0xFF800000> : vector<2x8xf32>
    %46 = vector.multi_reduction <maximumf>, %45, %cst_29 [2] : vector<2x8x8xf32> to vector<2x8xf32>
    %47 = vector.shape_cast %46 : vector<2x8xf32> to vector<2x8x1xf32>
    %48 = vector.broadcast %47 : vector<2x8x1xf32> to vector<2x8x8xf32>
    %49 = arith.subf %45, %48 : vector<2x8x8xf32>
    %50 = math.exp %49 : vector<2x8x8xf32>
    %cst_30 = arith.constant dense<0.000000e+00> : vector<2x8xf32>
    %51 = vector.multi_reduction <add>, %50, %cst_30 [2] : vector<2x8x8xf32> to vector<2x8xf32>
    %52 = vector.shape_cast %51 : vector<2x8xf32> to vector<2x8x1xf32>
    %53 = vector.broadcast %52 : vector<2x8x1xf32> to vector<2x8x8xf32>
    %54 = arith.divf %50, %53 : vector<2x8x8xf32>
    "tpu.trace_start"() <{level = 10 : i32, message = "bqk,bkd->bqd"}> : () -> ()
    %cst_31 = arith.constant dense<0.000000e+00> : vector<2x8x16xf32>
    %55 = tpu.matmul %54, %42, %cst_31 {dimension_numbers = #tpu.dot_dimension_numbers<[2], [1], [1], [2], [0, 0, 0, 1, 1, 2], [0], [0]>} : vector<2x8x8xf32>, vector<2x8x16xf32>, vector<2x8x16xf32> -> vector<2x8x16xf32>
    "tpu.trace_stop"() : () -> ()
    %56 = vector.extract_strided_slice %11 {offsets = [0, 0, 32], sizes = [2, 8, 16], strides = [1, 1, 1]} : vector<2x8x128xf32> to vector<2x8x16xf32>
    %57 = vector.extract_strided_slice %17 {offsets = [0, 0, 32], sizes = [2, 8, 16], strides = [1, 1, 1]} : vector<2x8x128xf32> to vector<2x8x16xf32>
    %58 = vector.extract_strided_slice %23 {offsets = [0, 0, 32], sizes = [2, 8, 16], strides = [1, 1, 1]} : vector<2x8x128xf32> to vector<2x8x16xf32>
    "tpu.trace_start"() <{level = 10 : i32, message = "bqd,bkd->bqk"}> : () -> ()
    %cst_32 = arith.constant dense<0.000000e+00> : vector<2x8x8xf32>
    %59 = tpu.matmul %56, %57, %cst_32 {dimension_numbers = #tpu.dot_dimension_numbers<[2], [2], [1], [1], [0, 0, 0, 1, 1, 1], [0], [0]>} : vector<2x8x16xf32>, vector<2x8x16xf32>, vector<2x8x8xf32> -> vector<2x8x8xf32>
    "tpu.trace_stop"() : () -> ()
    %cst_33 = arith.constant 2.500000e-01 : f32
    %60 = vector.broadcast %cst_33 : f32 to vector<2x8x8xf32>
    %61 = arith.mulf %59, %60 : vector<2x8x8xf32>
    %cst_34 = arith.constant dense<0xFF800000> : vector<2x8xf32>
    %62 = vector.multi_reduction <maximumf>, %61, %cst_34 [2] : vector<2x8x8xf32> to vector<2x8xf32>
    %63 = vector.shape_cast %62 : vector<2x8xf32> to vector<2x8x1xf32>
    %64 = vector.broadcast %63 : vector<2x8x1xf32> to vector<2x8x8xf32>
    %65 = arith.subf %61, %64 : vector<2x8x8xf32>
    %66 = math.exp %65 : vector<2x8x8xf32>
    %cst_35 = arith.constant dense<0.000000e+00> : vector<2x8xf32>
    %67 = vector.multi_reduction <add>, %66, %cst_35 [2] : vector<2x8x8xf32> to vector<2x8xf32>
    %68 = vector.shape_cast %67 : vector<2x8xf32> to vector<2x8x1xf32>
    %69 = vector.broadcast %68 : vector<2x8x1xf32> to vector<2x8x8xf32>
    %70 = arith.divf %66, %69 : vector<2x8x8xf32>
    "tpu.trace_start"() <{level = 10 : i32, message = "bqk,bkd->bqd"}> : () -> ()
    %cst_36 = arith.constant dense<0.000000e+00> : vector<2x8x16xf32>
    %71 = tpu.matmul %70, %58, %cst_36 {dimension_numbers = #tpu.dot_dimension_numbers<[2], [1], [1], [2], [0, 0, 0, 1, 1, 2], [0], [0]>} : vector<2x8x8xf32>, vector<2x8x16xf32>, vector<2x8x16xf32> -> vector<2x8x16xf32>
    "tpu.trace_stop"() : () -> ()
    %72 = vector.extract_strided_slice %11 {offsets = [0, 0, 48], sizes = [2, 8, 16], strides = [1, 1, 1]} : vector<2x8x128xf32> to vector<2x8x16xf32>
    %73 = vector.extract_strided_slice %17 {offsets = [0, 0, 48], sizes = [2, 8, 16], strides = [1, 1, 1]} : vector<2x8x128xf32> to vector<2x8x16xf32>
    %74 = vector.extract_strided_slice %23 {offsets = [0, 0, 48], sizes = [2, 8, 16], strides = [1, 1, 1]} : vector<2x8x128xf32> to vector<2x8x16xf32>
    "tpu.trace_start"() <{level = 10 : i32, message = "bqd,bkd->bqk"}> : () -> ()
    %cst_37 = arith.constant dense<0.000000e+00> : vector<2x8x8xf32>
    %75 = tpu.matmul %72, %73, %cst_37 {dimension_numbers = #tpu.dot_dimension_numbers<[2], [2], [1], [1], [0, 0, 0, 1, 1, 1], [0], [0]>} : vector<2x8x16xf32>, vector<2x8x16xf32>, vector<2x8x8xf32> -> vector<2x8x8xf32>
    "tpu.trace_stop"() : () -> ()
    %cst_38 = arith.constant 2.500000e-01 : f32
    %76 = vector.broadcast %cst_38 : f32 to vector<2x8x8xf32>
    %77 = arith.mulf %75, %76 : vector<2x8x8xf32>
    %cst_39 = arith.constant dense<0xFF800000> : vector<2x8xf32>
    %78 = vector.multi_reduction <maximumf>, %77, %cst_39 [2] : vector<2x8x8xf32> to vector<2x8xf32>
    %79 = vector.shape_cast %78 : vector<2x8xf32> to vector<2x8x1xf32>
    %80 = vector.broadcast %79 : vector<2x8x1xf32> to vector<2x8x8xf32>
    %81 = arith.subf %77, %80 : vector<2x8x8xf32>
    %82 = math.exp %81 : vector<2x8x8xf32>
    %cst_40 = arith.constant dense<0.000000e+00> : vector<2x8xf32>
    %83 = vector.multi_reduction <add>, %82, %cst_40 [2] : vector<2x8x8xf32> to vector<2x8xf32>
    %84 = vector.shape_cast %83 : vector<2x8xf32> to vector<2x8x1xf32>
    %85 = vector.broadcast %84 : vector<2x8x1xf32> to vector<2x8x8xf32>
    %86 = arith.divf %82, %85 : vector<2x8x8xf32>
    "tpu.trace_start"() <{level = 10 : i32, message = "bqk,bkd->bqd"}> : () -> ()
    %cst_41 = arith.constant dense<0.000000e+00> : vector<2x8x16xf32>
    %87 = tpu.matmul %86, %74, %cst_41 {dimension_numbers = #tpu.dot_dimension_numbers<[2], [1], [1], [2], [0, 0, 0, 1, 1, 2], [0], [0]>} : vector<2x8x8xf32>, vector<2x8x16xf32>, vector<2x8x16xf32> -> vector<2x8x16xf32>
    "tpu.trace_stop"() : () -> ()
    %88 = vector.extract_strided_slice %11 {offsets = [0, 0, 64], sizes = [2, 8, 16], strides = [1, 1, 1]} : vector<2x8x128xf32> to vector<2x8x16xf32>
    %89 = vector.extract_strided_slice %17 {offsets = [0, 0, 64], sizes = [2, 8, 16], strides = [1, 1, 1]} : vector<2x8x128xf32> to vector<2x8x16xf32>
    %90 = vector.extract_strided_slice %23 {offsets = [0, 0, 64], sizes = [2, 8, 16], strides = [1, 1, 1]} : vector<2x8x128xf32> to vector<2x8x16xf32>
    "tpu.trace_start"() <{level = 10 : i32, message = "bqd,bkd->bqk"}> : () -> ()
    %cst_42 = arith.constant dense<0.000000e+00> : vector<2x8x8xf32>
    %91 = tpu.matmul %88, %89, %cst_42 {dimension_numbers = #tpu.dot_dimension_numbers<[2], [2], [1], [1], [0, 0, 0, 1, 1, 1], [0], [0]>} : vector<2x8x16xf32>, vector<2x8x16xf32>, vector<2x8x8xf32> -> vector<2x8x8xf32>
    "tpu.trace_stop"() : () -> ()
    %cst_43 = arith.constant 2.500000e-01 : f32
    %92 = vector.broadcast %cst_43 : f32 to vector<2x8x8xf32>
    %93 = arith.mulf %91, %92 : vector<2x8x8xf32>
    %cst_44 = arith.constant dense<0xFF800000> : vector<2x8xf32>
    %94 = vector.multi_reduction <maximumf>, %93, %cst_44 [2] : vector<2x8x8xf32> to vector<2x8xf32>
    %95 = vector.shape_cast %94 : vector<2x8xf32> to vector<2x8x1xf32>
    %96 = vector.broadcast %95 : vector<2x8x1xf32> to vector<2x8x8xf32>
    %97 = arith.subf %93, %96 : vector<2x8x8xf32>
    %98 = math.exp %97 : vector<2x8x8xf32>
    %cst_45 = arith.constant dense<0.000000e+00> : vector<2x8xf32>
    %99 = vector.multi_reduction <add>, %98, %cst_45 [2] : vector<2x8x8xf32> to vector<2x8xf32>
    %100 = vector.shape_cast %99 : vector<2x8xf32> to vector<2x8x1xf32>
    %101 = vector.broadcast %100 : vector<2x8x1xf32> to vector<2x8x8xf32>
    %102 = arith.divf %98, %101 : vector<2x8x8xf32>
    "tpu.trace_start"() <{level = 10 : i32, message = "bqk,bkd->bqd"}> : () -> ()
    %cst_46 = arith.constant dense<0.000000e+00> : vector<2x8x16xf32>
    %103 = tpu.matmul %102, %90, %cst_46 {dimension_numbers = #tpu.dot_dimension_numbers<[2], [1], [1], [2], [0, 0, 0, 1, 1, 2], [0], [0]>} : vector<2x8x8xf32>, vector<2x8x16xf32>, vector<2x8x16xf32> -> vector<2x8x16xf32>
    "tpu.trace_stop"() : () -> ()
    %104 = vector.extract_strided_slice %11 {offsets = [0, 0, 80], sizes = [2, 8, 16], strides = [1, 1, 1]} : vector<2x8x128xf32> to vector<2x8x16xf32>
    %105 = vector.extract_strided_slice %17 {offsets = [0, 0, 80], sizes = [2, 8, 16], strides = [1, 1, 1]} : vector<2x8x128xf32> to vector<2x8x16xf32>
    %106 = vector.extract_strided_slice %23 {offsets = [0, 0, 80], sizes = [2, 8, 16], strides = [1, 1, 1]} : vector<2x8x128xf32> to vector<2x8x16xf32>
    "tpu.trace_start"() <{level = 10 : i32, message = "bqd,bkd->bqk"}> : () -> ()
    %cst_47 = arith.constant dense<0.000000e+00> : vector<2x8x8xf32>
    %107 = tpu.matmul %104, %105, %cst_47 {dimension_numbers = #tpu.dot_dimension_numbers<[2], [2], [1], [1], [0, 0, 0, 1, 1, 1], [0], [0]>} : vector<2x8x16xf32>, vector<2x8x16xf32>, vector<2x8x8xf32> -> vector<2x8x8xf32>
    "tpu.trace_stop"() : () -> ()
    %cst_48 = arith.constant 2.500000e-01 : f32
    %108 = vector.broadcast %cst_48 : f32 to vector<2x8x8xf32>
    %109 = arith.mulf %107, %108 : vector<2x8x8xf32>
    %cst_49 = arith.constant dense<0xFF800000> : vector<2x8xf32>
    %110 = vector.multi_reduction <maximumf>, %109, %cst_49 [2] : vector<2x8x8xf32> to vector<2x8xf32>
    %111 = vector.shape_cast %110 : vector<2x8xf32> to vector<2x8x1xf32>
    %112 = vector.broadcast %111 : vector<2x8x1xf32> to vector<2x8x8xf32>
    %113 = arith.subf %109, %112 : vector<2x8x8xf32>
    %114 = math.exp %113 : vector<2x8x8xf32>
    %cst_50 = arith.constant dense<0.000000e+00> : vector<2x8xf32>
    %115 = vector.multi_reduction <add>, %114, %cst_50 [2] : vector<2x8x8xf32> to vector<2x8xf32>
    %116 = vector.shape_cast %115 : vector<2x8xf32> to vector<2x8x1xf32>
    %117 = vector.broadcast %116 : vector<2x8x1xf32> to vector<2x8x8xf32>
    %118 = arith.divf %114, %117 : vector<2x8x8xf32>
    "tpu.trace_start"() <{level = 10 : i32, message = "bqk,bkd->bqd"}> : () -> ()
    %cst_51 = arith.constant dense<0.000000e+00> : vector<2x8x16xf32>
    %119 = tpu.matmul %118, %106, %cst_51 {dimension_numbers = #tpu.dot_dimension_numbers<[2], [1], [1], [2], [0, 0, 0, 1, 1, 2], [0], [0]>} : vector<2x8x8xf32>, vector<2x8x16xf32>, vector<2x8x16xf32> -> vector<2x8x16xf32>
    "tpu.trace_stop"() : () -> ()
    %120 = vector.extract_strided_slice %11 {offsets = [0, 0, 96], sizes = [2, 8, 16], strides = [1, 1, 1]} : vector<2x8x128xf32> to vector<2x8x16xf32>
    %121 = vector.extract_strided_slice %17 {offsets = [0, 0, 96], sizes = [2, 8, 16], strides = [1, 1, 1]} : vector<2x8x128xf32> to vector<2x8x16xf32>
    %122 = vector.extract_strided_slice %23 {offsets = [0, 0, 96], sizes = [2, 8, 16], strides = [1, 1, 1]} : vector<2x8x128xf32> to vector<2x8x16xf32>
    "tpu.trace_start"() <{level = 10 : i32, message = "bqd,bkd->bqk"}> : () -> ()
    %cst_52 = arith.constant dense<0.000000e+00> : vector<2x8x8xf32>
    %123 = tpu.matmul %120, %121, %cst_52 {dimension_numbers = #tpu.dot_dimension_numbers<[2], [2], [1], [1], [0, 0, 0, 1, 1, 1], [0], [0]>} : vector<2x8x16xf32>, vector<2x8x16xf32>, vector<2x8x8xf32> -> vector<2x8x8xf32>
    "tpu.trace_stop"() : () -> ()
    %cst_53 = arith.constant 2.500000e-01 : f32
    %124 = vector.broadcast %cst_53 : f32 to vector<2x8x8xf32>
    %125 = arith.mulf %123, %124 : vector<2x8x8xf32>
    %cst_54 = arith.constant dense<0xFF800000> : vector<2x8xf32>
    %126 = vector.multi_reduction <maximumf>, %125, %cst_54 [2] : vector<2x8x8xf32> to vector<2x8xf32>
    %127 = vector.shape_cast %126 : vector<2x8xf32> to vector<2x8x1xf32>
    %128 = vector.broadcast %127 : vector<2x8x1xf32> to vector<2x8x8xf32>
    %129 = arith.subf %125, %128 : vector<2x8x8xf32>
    %130 = math.exp %129 : vector<2x8x8xf32>
    %cst_55 = arith.constant dense<0.000000e+00> : vector<2x8xf32>
    %131 = vector.multi_reduction <add>, %130, %cst_55 [2] : vector<2x8x8xf32> to vector<2x8xf32>
    %132 = vector.shape_cast %131 : vector<2x8xf32> to vector<2x8x1xf32>
    %133 = vector.broadcast %132 : vector<2x8x1xf32> to vector<2x8x8xf32>
    %134 = arith.divf %130, %133 : vector<2x8x8xf32>
    "tpu.trace_start"() <{level = 10 : i32, message = "bqk,bkd->bqd"}> : () -> ()
    %cst_56 = arith.constant dense<0.000000e+00> : vector<2x8x16xf32>
    %135 = tpu.matmul %134, %122, %cst_56 {dimension_numbers = #tpu.dot_dimension_numbers<[2], [1], [1], [2], [0, 0, 0, 1, 1, 2], [0], [0]>} : vector<2x8x8xf32>, vector<2x8x16xf32>, vector<2x8x16xf32> -> vector<2x8x16xf32>
    "tpu.trace_stop"() : () -> ()
    %136 = vector.extract_strided_slice %11 {offsets = [0, 0, 112], sizes = [2, 8, 16], strides = [1, 1, 1]} : vector<2x8x128xf32> to vector<2x8x16xf32>
    %137 = vector.extract_strided_slice %17 {offsets = [0, 0, 112], sizes = [2, 8, 16], strides = [1, 1, 1]} : vector<2x8x128xf32> to vector<2x8x16xf32>
    %138 = vector.extract_strided_slice %23 {offsets = [0, 0, 112], sizes = [2, 8, 16], strides = [1, 1, 1]} : vector<2x8x128xf32> to vector<2x8x16xf32>
    "tpu.trace_start"() <{level = 10 : i32, message = "bqd,bkd->bqk"}> : () -> ()
    %cst_57 = arith.constant dense<0.000000e+00> : vector<2x8x8xf32>
    %139 = tpu.matmul %136, %137, %cst_57 {dimension_numbers = #tpu.dot_dimension_numbers<[2], [2], [1], [1], [0, 0, 0, 1, 1, 1], [0], [0]>} : vector<2x8x16xf32>, vector<2x8x16xf32>, vector<2x8x8xf32> -> vector<2x8x8xf32>
    "tpu.trace_stop"() : () -> ()
    %cst_58 = arith.constant 2.500000e-01 : f32
    %140 = vector.broadcast %cst_58 : f32 to vector<2x8x8xf32>
    %141 = arith.mulf %139, %140 : vector<2x8x8xf32>
    %cst_59 = arith.constant dense<0xFF800000> : vector<2x8xf32>
    %142 = vector.multi_reduction <maximumf>, %141, %cst_59 [2] : vector<2x8x8xf32> to vector<2x8xf32>
    %143 = vector.shape_cast %142 : vector<2x8xf32> to vector<2x8x1xf32>
    %144 = vector.broadcast %143 : vector<2x8x1xf32> to vector<2x8x8xf32>
    %145 = arith.subf %141, %144 : vector<2x8x8xf32>
    %146 = math.exp %145 : vector<2x8x8xf32>
    %cst_60 = arith.constant dense<0.000000e+00> : vector<2x8xf32>
    %147 = vector.multi_reduction <add>, %146, %cst_60 [2] : vector<2x8x8xf32> to vector<2x8xf32>
    %148 = vector.shape_cast %147 : vector<2x8xf32> to vector<2x8x1xf32>
    %149 = vector.broadcast %148 : vector<2x8x1xf32> to vector<2x8x8xf32>
    %150 = arith.divf %146, %149 : vector<2x8x8xf32>
    "tpu.trace_start"() <{level = 10 : i32, message = "bqk,bkd->bqd"}> : () -> ()
    %cst_61 = arith.constant dense<0.000000e+00> : vector<2x8x16xf32>
    %151 = tpu.matmul %150, %138, %cst_61 {dimension_numbers = #tpu.dot_dimension_numbers<[2], [1], [1], [2], [0, 0, 0, 1, 1, 2], [0], [0]>} : vector<2x8x8xf32>, vector<2x8x16xf32>, vector<2x8x16xf32> -> vector<2x8x16xf32>
    "tpu.trace_stop"() : () -> ()
    %152 = tpu.concatenate %39, %55, %71, %87, %103, %119, %135, %151 in 2 : vector<2x8x16xf32>, vector<2x8x16xf32>, vector<2x8x16xf32>, vector<2x8x16xf32>, vector<2x8x16xf32>, vector<2x8x16xf32>, vector<2x8x16xf32>, vector<2x8x16xf32> -> vector<2x8x128xf32>
    %153 = vector.shape_cast %152 : vector<2x8x128xf32> to vector<16x128xf32>
    %c0_62 = arith.constant 0 : index
    %c0_63 = arith.constant 0 : index
    %154 = vector.load %arg10[%c0_62, %c0_63] : memref<128x128xf32, #tpu.memory_space<vmem>>, vector<128x128xf32>
    %cst_64 = arith.constant dense<0.000000e+00> : vector<16x128xf32>
    %155 = tpu.matmul %153, %154, %cst_64 {dimension_numbers = #tpu.dot_dimension_numbers<[1], [0], [0], [1], [0, 0, 1, 1], [], []>} : vector<16x128xf32>, vector<128x128xf32>, vector<16x128xf32> -> vector<16x128xf32>
    %c0_65 = arith.constant 0 : index
    %c0_66 = arith.constant 0 : index
    %156 = vector.load %arg11[%c0_65, %c0_66] : memref<1x128xf32, #tpu.memory_space<vmem>>, vector<1x128xf32>
    %157 = vector.broadcast %156 : vector<1x128xf32> to vector<16x128xf32>
    %158 = arith.addf %155, %157 : vector<16x128xf32>
    %159 = vector.shape_cast %158 : vector<16x128xf32> to vector<2x8x128xf32>
    %c0_67 = arith.constant 0 : index
    %c0_68 = arith.constant 0 : index
    %c0_69 = arith.constant 0 : index
    %160 = vector.load %arg12[%c0_67, %c0_68, %c0_69] : memref<2x8x128xf32, #tpu.memory_space<vmem>>, vector<2x8x128xf32>
    tpu.vector_store %arg12[%c0_67, %c0_68, %c0_69], %159 {strides = array<i32>} : memref<2x8x128xf32, #tpu.memory_space<vmem>>, vector<2x8x128xf32>,
    return
  }
  func.func @transform_0(%arg0: i32) -> (i32, i32, i32) {
    %c0_i32 = arith.constant 0 : i32
    %c0_i32_0 = arith.constant 0 : i32
    %c0_i32_1 = arith.constant 0 : i32
    return %arg0, %c0_i32, %c0_i32_0 : i32, i32, i32
  }
  func.func @transform_1(%arg0: i32) -> (i32, i32, i32) {
    %c0_i32 = arith.constant 0 : i32
    %c0_i32_0 = arith.constant 0 : i32
    %c0_i32_1 = arith.constant 0 : i32
    return %arg0, %c0_i32, %c0_i32_0 : i32, i32, i32
  }
  func.func @transform_2(%arg0: i32) -> (i32, i32, i32) {
    %c0_i32 = arith.constant 0 : i32
    %c0_i32_0 = arith.constant 0 : i32
    %c0_i32_1 = arith.constant 0 : i32
    return %arg0, %c0_i32, %c0_i32_0 : i32, i32, i32
  }
  func.func @transform_3(%arg0: i32) -> (i32, i32) {
    %c0_i32 = arith.constant 0 : i32
    %c0_i32_0 = arith.constant 0 : i32
    %c0_i32_1 = arith.constant 0 : i32
    return %c0_i32, %c0_i32_0 : i32, i32
  }
  func.func @transform_4(%arg0: i32) -> (i32, i32) {
    %c0_i32 = arith.constant 0 : i32
    %c0_i32_0 = arith.constant 0 : i32
    %c0_i32_1 = arith.constant 0 : i32
    return %c0_i32, %c0_i32_0 : i32, i32
  }
  func.func @transform_5(%arg0: i32) -> (i32, i32) {
    %c0_i32 = arith.constant 0 : i32
    %c0_i32_0 = arith.constant 0 : i32
    %c0_i32_1 = arith.constant 0 : i32
    return %c0_i32, %c0_i32_0 : i32, i32
  }
  func.func @transform_6(%arg0: i32) -> (i32, i32) {
    %c0_i32 = arith.constant 0 : i32
    %c0_i32_0 = arith.constant 0 : i32
    %c0_i32_1 = arith.constant 0 : i32
    return %c0_i32, %c0_i32_0 : i32, i32
  }
  func.func @transform_7(%arg0: i32) -> (i32, i32) {
    %c0_i32 = arith.constant 0 : i32
    %c0_i32_0 = arith.constant 0 : i32
    %c0_i32_1 = arith.constant 0 : i32
    return %c0_i32, %c0_i32_0 : i32, i32
  }
  func.func @transform_8(%arg0: i32) -> (i32, i32) {
    %c0_i32 = arith.constant 0 : i32
    %c0_i32_0 = arith.constant 0 : i32
    %c0_i32_1 = arith.constant 0 : i32
    return %c0_i32, %c0_i32_0 : i32, i32
  }
  func.func @transform_9(%arg0: i32) -> (i32, i32) {
    %c0_i32 = arith.constant 0 : i32
    %c0_i32_0 = arith.constant 0 : i32
    %c0_i32_1 = arith.constant 0 : i32
    return %c0_i32, %c0_i32_0 : i32, i32
  }
  func.func @transform_10(%arg0: i32) -> (i32, i32) {
    %c0_i32 = arith.constant 0 : i32
    %c0_i32_0 = arith.constant 0 : i32
    %c0_i32_1 = arith.constant 0 : i32
    return %c0_i32, %c0_i32_0 : i32, i32
  }
  func.func @transform_11(%arg0: i32) -> (i32, i32, i32) {
    %c0_i32 = arith.constant 0 : i32
    %c0_i32_0 = arith.constant 0 : i32
    %c0_i32_1 = arith.constant 0 : i32
    return %arg0, %c0_i32, %c0_i32_0 : i32, i32, i32
  }
}

</mosaic_0001>

<bundles_post_ra>
// kernel: tpu_custom_call.1
= control target key start
LH: loop header
LB: loop body
LE: loop exit
PB: predicated region body
PF: predicated region fallthrough
CT: control target
= control target key end

     0   :  { %s5593_s0 = inlined_call_operand.hbm [shape: f32[4,8,128], index: 0, kind: input, shape index: {}]   ;;  %s5594_s1 = inlined_call_operand.hbm [shape: f32[4,8,128], index: 1, kind: input, shape index: {}]   ;;  %s5595_s2 = inlined_call_operand.hbm [shape: f32[4,8,128], index: 2, kind: input, shape index: {}]   ;;  %s5596_s3 = inlined_call_operand.hbm [shape: f32[128,128], index: 3, kind: input, shape index: {}]   ;;  %s5597_s4 = inlined_call_operand.vmem [shape: f32[1,128], index: 4, kind: input, shape index: {}]   ;;  %s5598_s5 = inlined_call_operand.hbm [shape: f32[128,128], index: 5, kind: input, shape index: {}]   ;;  %s5599_s6 = inlined_call_operand.vmem [shape: f32[1,128], index: 6, kind: input, shape index: {}]   ;;  %s5600_s7 = inlined_call_operand.hbm [shape: f32[128,128], index: 7, kind: input, shape index: {}]   ;;  %s5601_s8 = inlined_call_operand.vmem [shape: f32[1,128], index: 8, kind: input, shape index: {}]   ;;  %s5602_s9 = inlined_call_operand.hbm [shape: f32[128,128], index: 9, kind: input, shape index: {}]   ;;  %s5603_s10 = inlined_call_operand.vmem [shape: f32[1,128], index: 10, kind: input, shape index: {}]   ;;  %s5604_s11 = inlined_call_operand.hbm [shape: f32[4,8,128], index: 11, kind: output, shape index: {}]  }
   0x1   :  { %5625 = sst [smem:[#allocation26_spill]] %s5594_s1 }
   0x2   :  { %5626 = sst [smem:[#allocation27_spill]] %s5596_s3 }
   0x3   :  { %5627 = sst [smem:[#allocation28_spill]] %s5600_s7 }
   0x4   :  { %5628 = sst [smem:[#allocation29_spill]] %s5604_s11 }
   0x5   :  { %16 = vsyncpa [#allocation3], 0 }
   0x6   :  { %18 = vsyncpa [#allocation3 + $0x1], 0 }
   0x7   :  { %19 = vsyncpa [#allocation6], 0 }
   0x8   :  { %21 = vsyncpa [#allocation6 + $0x1], 0 }
   0x9   :  { %22 = vsyncpa [#allocation9], 0 }
   0xa   :  { %23 = vsyncpa [#allocation12], 0 }
   0xb   :  { %24 = vsyncpa [#allocation4], 0 }
   0xc   :  { %26 = vsyncpa [#allocation4 + $0x1], 0  ;;  %s4916_s17 = smov 0   ;;  %s4918_s18 = smov 0  }
   0xd   :  { %s4920_s19 = smov 0   ;;  %s4922_s20 = smov 0  }
   0xe LB: > { %5629 = sst [smem:[#allocation20_spill]] %s4821_s17  ;;  %s4937_s21 = sadd.s32 4294967295, %s4833_s20   ;;  %s4833_s20 = sphi %s4922_s20, %s5665_s20   ;;  %s4829_s19 = sphi %s4920_s19, %s5669_s19   ;;  %s4825_s18 = sphi %s4918_s18, %s5668_s18   ;;  %s4821_s17 = sphi %s4916_s17, %s5667_s17  }
   0xf   : > { %5630 = sst [smem:[#allocation21_spill]] %s4833_s20  ;;  %s3838_s22 = sadd.s32 4294967294, %s4833_s20  }
  0x10   : > { %p52_p0 = scmp.ne.s32.totalorder %s4825_s18, %s4821_s17  ;;  %p5616_p1 = scmp.eq.s32.totalorder %s4937_s21, 0 }
  0x11   : > { %p296_p2 = scmp.eq.s32.totalorder %s4937_s21, 1  ;;  %p302_p3 = scmp.eq.s32.totalorder %s3838_s22, 1 }
  0x12   : > { %p4946_p4 = por %p5616_p1, %p52_p0  ;;  %p3839_p5 = scmp.ge.s32.totalorder %s4833_s20, 1 }
  0x13   : > { %p4951_p6 = por %p302_p3, %p52_p0  ;;  %p309_p7 = scmp.lt.s32.totalorder %s4833_s20, 3 }
  0x14   : > { %s5631_s23 = scalar_select %p4946_p4, 1, 0 }
  0x15   : > { %s5632_s24 = scalar_select %p4951_p6, 1, 0 }
  0x16   : > { %p4956_p8 = pnand %p3839_p5, %p309_p7  ;;  %s4835_s26 = smov [#allocation8]  }
  0x17   : > { %5633 = sst [smem:[#allocation22_spill]] %s5632_s24  ;;  %s321_s27 = sshll.u32 %s4835_s26, 4  ;;  %s322_s27 = int_to_ptr.vmem [resolvable:$true] %s321_s27 }
  0x18   : > { %s5634_s25 = scalar_select %p4956_p8, 1, 0 }
  0x19   : > { %p4384_p9 = pneg %p4956_p8  ;;  %s4836_s29 = smov [#allocation11]  }
  0x1a   : > { %s353_s30 = sshll.u32 %s4836_s29, 4  ;;  %s4580_s12 = scalar_lea.vmem %s322_s27, 2048  ;;  %s354_s30 = int_to_ptr.vmem [resolvable:$true] %s353_s30 }
  0x1b   : > { %p4965_p11 = pnand %p4384_p9, %p5616_p1  ;;  %p4581_p13 = scmp.ne.s32.totalorder %s322_s27, %s4580_s12 }
  0x1c   : > { %p4588_p5 = scmp.lt.s32.totalorder %s322_s27, %s322_s27  ;;  %p4589_p7 = scmp.lt.s32.totalorder %s4580_s12, %s4580_s12 }
  0x1d   : > { %s5635_s28 = scalar_select %p4965_p11, 1, 0 }
  0x1e   : > { %p5617_p12 = pneg %p4965_p11  ;;  %p4590_p10 = por %p4589_p7, %p4588_p5 }
  0x20   : > { %p4583_p0 = pnand %p4581_p13, %p5617_p12 }
  0x22   : > { %p4584_p3 = pneg %p4583_p0 }
  0x24   : > { %p4591_p9 = pnand %p4590_p10, %p4584_p3 }
  0x26   : > { %4594 = shalt.err (!%p4591_p9)
}
  0x27   : > { %s5605_s13 = smov 128   ;;  %s5607_s14 = smov 8  }
  0x28   : > { %s5636_s3 = sld [smem:[#allocation27_spill]]  ;;  %s4606_s22 = scalar_lea.vmem %s354_s30, 2048 }
  0x29   : > { %p4607_p13 = scmp.ne.s32.totalorder %s354_s30, %s4606_s22  ;;  %p4614_p10 = scmp.lt.s32.totalorder %s354_s30, %s354_s30 }
  0x2a   : > { %p4615_p3 = scmp.lt.s32.totalorder %s4606_s22, %s4606_s22 }
  0x2b   : > { %p4609_p0 = pnand %p4607_p13, %p5617_p12 }
  0x2c   : > { %p4616_p7 = por %p4615_p3, %p4614_p10 }
  0x2d   : > { %p4610_p5 = pneg %p4609_p0 }
  0x2e   : > { %4387 = dma.hbm_to_vmem [thread:$0]  (!%p4965_p11), %s5636_s3, 2048, %s322_s27, [#allocation9], %s5605_s13, %s5605_s13, %s5607_s14  }
  0x2f   : > { %p4617_p9 = pnand %p4616_p7, %p4610_p5 }
  0x31   : > { %4620 = shalt.err (!%p4617_p9)
}
  0x32   : > { %s5637_s7 = sld [smem:[#allocation28_spill]]  ;;  %s4994_s27 = sadd.s32 1, %s4833_s20  }
  0x33   : > { %5638 = sst [smem:[#allocation23_spill]] %s4994_s27  ;;  %s39_s12 = sadd.s32 1, %s4829_s19 }
  0x34   : > { %s36_s15 = ssub.s32 %s4833_s20, %s4994_s27  ;;  %p46_p13 = scmp.ne.s32.totalorder %s4829_s19, %s4825_s18 }
  0x35   : > { %p37_p0 = scmp.eq.s32.totalorder %s36_s15, 0  ;;  %p47_p5 = scmp.eq.s32.totalorder %s4833_s20, 0 }
  0x36   : > { %p5004_p10 = por %p296_p2, %p46_p13  ;;  %p4415_p3 = scmp.lt.s32.totalorder %s4833_s20, 2 }
  0x37   : > { %s5010_s22 = scalar_select %p37_p0, %s4829_s19, %s39_s12  }
  0x38   : > { %4393 = dma.hbm_to_vmem [thread:$0]  (!%p4965_p11), %s5637_s7, 2048, %s354_s30, [#allocation12], %s5605_s13, %s5605_s13, %s5607_s14  }
  0x39   : > { %s5639_s16 = scalar_select %p5004_p10, 1, 0 }
  0x3a   : > { %5641 = sst [smem:[#allocation25_spill]] %s5010_s22  ;;  %p48_p7 = por %p47_p5, %p46_p13 }
  0x3b   : > { %5640 = sst [smem:[#allocation24_spill]] %s5639_s16  ;;  %s5609_s26 = sand.u32 1, %s4829_s19  }
  0x3c   : > { %s5015_s30 = sshll.u32 %s5609_s26, 4  ;;  %s5018_s29 = sshll.u32 %s4833_s20, 8 }
  0x3d   : > { %p5020_p9 = pnand %p4415_p3, %p48_p7  ;;  %s407_s13 = sand.u32 1, %s4833_s20  }
  0x3e   : > { %s5643_s1 = sld [smem:[#allocation26_spill]]  ;;  %s411_s26 = scalar_lea.vmem [#allocation5], %s5015_s30 }
  0x3f   : > { %s418_s7 = sshll.u32 %s411_s26, 4  ;;  %s4839_s22 = smov [#allocation10]   ;;  %s5032_s7 = int_to_ptr.vmem [resolvable:$true] %s418_s7 }
  0x40   : > { %s5034_s27 = sshll.u32 %s4839_s22, 4  ;;  %s5036_s24 = scalar_lea.sflag [#allocation6], %s407_s13  ;;  %s338_s27 = int_to_ptr.vmem [resolvable:$true] %s5034_s27 }
  0x41   : > { %p5042_p13 = pneg %p5020_p9 }
  0x44   : > { %s5029_s12 = scalar_lea.hbm %s5643_s1, %s5018_s29  ;;  %s4626_s26 = scalar_lea.hbm %s5643_s1, 512 }
  0x45   : > { %s4621_s17 = scalar_lea.hbm %s5029_s12, 256  ;;  %p4627_p3 = scmp.lt.s32.totalorder %s5029_s12, %s5643_s1 }
  0x46   : > { %p4622_p2 = scmp.ne.s32.totalorder %s5029_s12, %s4621_s17  ;;  %p4628_p7 = scmp.lt.s32.totalorder %s4626_s26, %s4621_s17 }
  0x48   : > { %p4624_p0 = pnand %p5042_p13, %p4622_p2  ;;  %p4629_p1 = por %p4628_p7, %p4627_p3 }
  0x4a   : > { %p4625_p5 = pneg %p4624_p0 }
  0x4c   : > { %p4630_p12 = pnand %p4629_p1, %p4625_p5 }
  0x4e   : > { %4633 = shalt.err (!%p4630_p12)
}
  0x4f   : > { %s4634_s13 = scalar_lea.vmem %s5032_s7, 256  ;;  %s4840_s16 = smov [#allocation5]  }
  0x50   : > { %p4635_p6 = scmp.ne.s32.totalorder %s5032_s7, %s4634_s13  ;;  %s4639_s3 = sshll.u32 %s4840_s16, 4  ;;  %s4640_s3 = int_to_ptr.vmem [resolvable:$false] %s4639_s3 }
  0x51   : > { %s4641_s14 = scalar_lea.vmem %s4640_s3, 512  ;;  %p4642_p10 = scmp.lt.s32.totalorder %s5032_s7, %s4640_s3 }
  0x52   : > { %p4637_p2 = pnand %p4635_p6, %p5042_p13  ;;  %p4643_p4 = scmp.lt.s32.totalorder %s4641_s14, %s4634_s13 }
  0x54   : > { %p4638_p0 = pneg %p4637_p2  ;;  %p4644_p8 = por %p4643_p4, %p4642_p10 }
  0x56   : > { %p4645_p11 = pnand %p4644_p8, %p4638_p0 }
  0x58   : > { %4648 = shalt.err (!%p4645_p11)
}
  0x59   : > { %s5645_s11 = smov 8   ;;  %s5646_s17 = smov 128  }
  0x5a   : > { %4403 = dma.hbm_to_vmem [thread:$0]  (!%p5020_p9), %s5029_s12, 256, %s5032_s7, %s5036_s24, %s5646_s17, %s5646_s17, %s5645_s11  }
  0x5b   : > { %s4660_s16 = scalar_lea.vmem %s338_s27, 2048  ;;  %p5647_p6 = scmp.ne.s32.totalorder %s5635_s28, 0 }
  0x5c   : > { %p4661_p1 = scmp.ne.s32.totalorder %s338_s27, %s4660_s16  ;;  %p4668_p8 = scmp.lt.s32.totalorder %s338_s27, %s338_s27 }
  0x5d   : > { %p5648_p12 = pneg %p5647_p6  ;;  %p4669_p11 = scmp.lt.s32.totalorder %s4660_s16, %s4660_s16 }
  0x5f   : > { %p4663_p5 = pnand %p4661_p1, %p5648_p12  ;;  %p4670_p10 = por %p4669_p11, %p4668_p8 }
  0x61   : > { %p4664_p4 = pneg %p4663_p5 }
  0x63   : > { %p4671_p3 = pnand %p4670_p10, %p4664_p4 }
  0x65   : > { %4674 = shalt.err (!%p4671_p3)
}
  0x66   : > { %4390 = dma.hbm_to_vmem [thread:$0]  (!%p5647_p6), %s5598_s5, 2048, %s338_s27, [#allocation9], %s5646_s17, %s5646_s17, %s5645_s11  }
  0x67   : > { %s4841_s7 = smov [#allocation13]   ;;  %p5649_p2 = pmov %p5648_p12 }
  0x68   : > { %s369_s12 = sshll.u32 %s4841_s7, 4  ;;  %s370_s12 = int_to_ptr.vmem [resolvable:$true] %s369_s12 }
  0x69   : > { %s4686_s13 = scalar_lea.vmem %s370_s12, 2048  ;;  %p4694_p12 = scmp.lt.s32.totalorder %s370_s12, %s370_s12 }
  0x6a   : > { %p4687_p7 = scmp.ne.s32.totalorder %s370_s12, %s4686_s13  ;;  %p4695_p5 = scmp.lt.s32.totalorder %s4686_s13, %s4686_s13 }
  0x6c   : > { %p4689_p0 = pnand %p4687_p7, %p5649_p2  ;;  %p4696_p4 = por %p4695_p5, %p4694_p12 }
  0x6e   : > { %p4690_p1 = pneg %p4689_p0 }
  0x70   : > { %p4697_p8 = pnand %p4696_p4, %p4690_p1 }
  0x72   : > { %4700 = shalt.err (!%p4697_p8)
}
  0x73   : > { %4396 = dma.hbm_to_vmem [thread:$0]  (!%p5647_p6), %s5602_s9, 2048, %s370_s12, [#allocation12], %s5646_s17, %s5646_s17, %s5645_s11  }
  0x74   : > { %s5095_s26 = scalar_lea.hbm %s5593_s0, %s5018_s29  ;;  %s390_s28 = scalar_lea.vmem [#allocation2], %s5015_s30 }
  0x75   : > { %s397_s22 = sshll.u32 %s390_s28, 4  ;;  %s5650_s7 = sand.u32 1, %s4829_s19   ;;  %s5098_s22 = int_to_ptr.vmem [resolvable:$true] %s397_s22 }
  0x76   : > { %s387_s13 = scalar_lea.sflag [#allocation3], %s5650_s7  ;;  %s4701_s27 = scalar_lea.hbm %s5095_s26, 256 }
  0x77   : > { %p4702_p11 = scmp.ne.s32.totalorder %s5095_s26, %s4701_s27  ;;  %s4706_s14 = scalar_lea.hbm %s5593_s0, 512 }
  0x78   : > { %p4707_p6 = scmp.lt.s32.totalorder %s5095_s26, %s5593_s0  ;;  %p4708_p7 = scmp.lt.s32.totalorder %s4706_s14, %s4701_s27 }
  0x79   : > { %p4704_p10 = pnand %p4702_p11, %p5042_p13 }
  0x7a   : > { %p4709_p2 = por %p4708_p7, %p4707_p6 }
  0x7b   : > { %p4705_p3 = pneg %p4704_p10 }
  0x7d   : > { %p4710_p0 = pnand %p4709_p2, %p4705_p3 }
  0x7f   : > { %4713 = shalt.err (!%p4710_p0)
}
  0x80   : > { %s4714_s28 = scalar_lea.vmem %s5098_s22, 256  ;;  %s4842_s7 = smov [#allocation2]  }
  0x81   : > { %p4715_p1 = scmp.ne.s32.totalorder %s5098_s22, %s4714_s28  ;;  %s4719_s12 = sshll.u32 %s4842_s7, 4  ;;  %s4720_s12 = int_to_ptr.vmem [resolvable:$false] %s4719_s12 }
  0x82   : > { %s4721_s3 = scalar_lea.vmem %s4720_s12, 512  ;;  %p4722_p4 = scmp.lt.s32.totalorder %s5098_s22, %s4720_s12 }
  0x83   : > { %p4717_p12 = pnand %p4715_p1, %p5042_p13  ;;  %p4723_p8 = scmp.lt.s32.totalorder %s4721_s3, %s4714_s28 }
  0x85   : > { %p4718_p5 = pneg %p4717_p12  ;;  %p4724_p11 = por %p4723_p8, %p4722_p4 }
  0x87   : > { %p4725_p10 = pnand %p4724_p11, %p4718_p5 }
  0x89   : > { %4728 = shalt.err (!%p4725_p10)
}
  0x8a   : > { %4400 = dma.hbm_to_vmem [thread:$0]  (!%p5020_p9), %s5095_s26, 256, %s5098_s22, %s387_s13, %s5646_s17, %s5646_s17, %s5645_s11  }
  0x8b   : > { %s5129_s14 = scalar_lea.hbm %s5595_s2, %s5018_s29  ;;  %s432_s16 = scalar_lea.vmem [#allocation7], %s5015_s30 }
  0x8c   : > { %s439_s28 = sshll.u32 %s432_s16, 4  ;;  %s4729_s7 = scalar_lea.hbm %s5129_s14, 256  ;;  %s440_s28 = int_to_ptr.vmem [resolvable:$true] %s439_s28 }
  0x8d   : > { %p4730_p3 = scmp.ne.s32.totalorder %s5129_s14, %s4729_s7  ;;  %s4734_s26 = scalar_lea.hbm %s5595_s2, 512 }
  0x8e   : > { %p4735_p2 = scmp.lt.s32.totalorder %s5129_s14, %s5595_s2  ;;  %p4736_p0 = scmp.lt.s32.totalorder %s4734_s26, %s4729_s7 }
  0x8f   : > { %p4732_p6 = pnand %p4730_p3, %p5042_p13 }
  0x90   : > { %p4737_p1 = por %p4736_p0, %p4735_p2 }
  0x91   : > { %p4733_p7 = pneg %p4732_p6 }
  0x93   : > { %p4738_p12 = pnand %p4737_p1, %p4733_p7 }
  0x95   : > { %4741 = shalt.err (!%p4738_p12)
}
  0x96   : > { %s4742_s30 = scalar_lea.vmem %s440_s28, 256  ;;  %s4843_s29 = smov [#allocation7]  }
  0x97   : > { %p4743_p5 = scmp.ne.s32.totalorder %s440_s28, %s4742_s30  ;;  %s4747_s1 = sshll.u32 %s4843_s29, 4  ;;  %s4748_s1 = int_to_ptr.vmem [resolvable:$false] %s4747_s1 }
  0x98   : > { %s4749_s27 = scalar_lea.vmem %s4748_s1, 512  ;;  %p4750_p11 = scmp.lt.s32.totalorder %s440_s28, %s4748_s1 }
  0x99   : > { %p4745_p4 = pnand %p4743_p5, %p5042_p13  ;;  %p4751_p10 = scmp.lt.s32.totalorder %s4749_s27, %s4742_s30 }
  0x9b   : > { %p4746_p8 = pneg %p4745_p4  ;;  %p4752_p3 = por %p4751_p10, %p4750_p11 }
  0x9d   : > { %p4753_p6 = pnand %p4752_p3, %p4746_p8 }
  0x9f   : > { %4756 = shalt.err (!%p4753_p6)
}
  0xa0   : > { %4406 = dma.hbm_to_vmem [thread:$0]  (!%p5020_p9), %s5129_s14, 256, %s440_s28, %s5036_s24, %s5646_s17, %s5646_s17, %s5645_s11  }
  0xa1   : > { %p5651_p13 = scmp.ne.s32.totalorder %s5634_s25, 0 }
  0xa2   : > { %s5155_s20 = sand.u32 (!%p5651_p13), 1, %s4825_s18   ;;  %p5652_p7 = scmp.ne.s32.totalorder (!%p5651_p13), %s5631_s23, 0 }
  0xa3   : > { %451 = sbr.rel (%p5651_p13) target bundleno = 5150 (0x141e), region = 64  ;;  %s5158_s16 = sshll.u32 (!%p5651_p13), %s5155_s20, 4 }
  0xa4   : > { %s454_s7 = scalar_lea.sflag (!%p5651_p13), [#allocation3], %s5155_s20  ;;  %s457_s15 = scalar_lea.vmem (!%p5651_p13), [#allocation2], %s5158_s16 }
  0xa8   : > { %4800 = dma.done.wait (%p5652_p7), %s454_s7, 256  }
  0xa9   : > { %4802 = vsyncadd (%p5652_p7), %s454_s7, 4294967040  ;;  %s462_s24 = sand.u32 1, %s4937_s21   ;;  %s466_s11 = scalar_lea.vmem [#allocation5], %s5158_s16 }
  0xaa   : > { %s463_s25 = scalar_lea.sflag [#allocation6], %s462_s24 }
  0xab   : > { %4804 = dma.done.wait (%p5652_p7), %s463_s25, 512  }
  0xac   : > { %4806 = vsyncadd (%p5652_p7), %s463_s25, 4294966784  ;;  %s475_s17 = scalar_lea.vmem [#allocation7], %s5158_s16  ;;  %p5653_p9 = scmp.eq.s32.totalorder %s4937_s21, 0 }
  0xae   : > { %4808 = dma.done.wait (%p5653_p9), [#allocation9], 4096   ;;  %p5654_p2 = pmov %p5653_p9 }
  0xb0   : > { %4810 = vsyncadd (%p5654_p2), [#allocation9], 4294963200  ;;  %p5655_p0 = pmov %p5654_p2 }
  0xb2   : > { %4812 = dma.done.wait (%p5655_p0), [#allocation12], 4096   ;;  %p5656_p1 = pmov %p5655_p0 }
  0xb3   : > { %v565_v0 = vld [vmem:[#allocation8 + $0x78] sm:$0xff]  ;;  %v564_v2 = vld [vmem:[#allocation8 + $0x70] sm:$0xff]  ;;  %v563_v4 = vld [vmem:[#allocation8 + $0x68] sm:$0xff]  ;;  %v4844_v36 = vmov 0.0   ;;  %vm4845_vm0 = vmmov 0   ;;  %vm844_vm1 = vcmask 130048  }
  0xb4   : > { %4814 = vsyncadd (%p5656_p1), [#allocation12], 4294963200  ;;  %v663_v1 = vld [vmem:[#allocation10 + $0x78] sm:$0xff]  ;;  %4060 = vmatprep.subr.mxu0 %v565_v0  ;;  %v662_v3 = vld [vmem:[#allocation10 + $0x70] sm:$0xff]  ;;  %s4846_s3 = smov 112   ;;  %vm999_vm2 = vcmask 64512  }
  0xb5   : > { %4095 = vmatprep.subr.mxu1 %v663_v1  ;;  %4061 = vmatpush3.msra.mxu0 %v565_v0  ;;  %v661_v5 = vld [vmem:[#allocation10 + $0x68] sm:$0xff]  ;;  %v562_v6 = vld [vmem:[#allocation8 + $0x60] sm:$0xff]  ;;  %v561_v8 = vld [vmem:[#allocation8 + $0x58] sm:$0xff]  ;;  %s4847_s13 = smov 96   ;;  %s4848_s30 = smov 80   ;;  %vm3552_vm3 = vcmask 261120  }
  0xb6   : > { %4096 = vmatpush3.msra.mxu1 %v663_v1  ;;  %4062 = vmatprep.subr.mxu0 %v564_v2  ;;  %v660_v7 = vld [vmem:[#allocation10 + $0x60] sm:$0xff]  ;;  %v659_v9 = vld [vmem:[#allocation10 + $0x58] sm:$0xff]  ;;  %v560_v10 = vld [vmem:[#allocation8 + $0x50] sm:$0xff]  ;;  %s4849_s29 = smov 64   ;;  %s4850_s1 = smov 48   ;;  %vm3555_vm4 = vcmask 392192  }
  0xb7   : > { %4097 = vmatprep.subr.mxu1 %v662_v3  ;;  %4063 = vmatpush3.msra.mxu0 %v564_v2  ;;  %v658_v11 = vld [vmem:[#allocation10 + $0x50] sm:$0xff]  ;;  %v559_v12 = vld [vmem:[#allocation8 + $0x48] sm:$0xff]  ;;  %v558_v14 = vld [vmem:[#allocation8 + $0x40] sm:$0xff]  ;;  %s4851_s27 = smov 32   ;;  %s4852_s7 = smov 16   ;;  %vm3558_vm5 = vcmask 523264  }
  0xb8   : > { %4098 = vmatpush3.msra.mxu1 %v662_v3  ;;  %4064 = vmatprep.subr.mxu0 %v563_v4  ;;  %v657_v13 = vld [vmem:[#allocation10 + $0x48] sm:$0xff]  ;;  %v656_v15 = vld [vmem:[#allocation10 + $0x40] sm:$0xff]  ;;  %v557_v16 = vld [vmem:[#allocation8 + $0x38] sm:$0xff]  ;;  %vm3561_vm6 = vcmask 654336   ;;  %vm3564_vm7 = vcmask 785408   ;;  %vm3567_vm8 = vcmask 916480  }
  0xb9   : > { %4099 = vmatprep.subr.mxu1 %v661_v5  ;;  %4065 = vmatpush3.msra.mxu0 %v563_v4  ;;  %v655_v17 = vld [vmem:[#allocation10 + $0x38] sm:$0xff]  ;;  %v556_v18 = vld [vmem:[#allocation8 + $0x30] sm:$0xff]  ;;  %v555_v20 = vld [vmem:[#allocation8 + $0x28] sm:$0xff]  ;;  %s5657_s25 = sld [smem:[#allocation24_spill]]  ;;  %s3923_s23 = sshll.u32 %s4937_s21, 8 }
  0xba   : > { %4100 = vmatpush3.msra.mxu1 %v661_v5  ;;  %4066 = vmatprep.subr.mxu0 %v562_v6  ;;  %v654_v19 = vld [vmem:[#allocation10 + $0x30] sm:$0xff]  ;;  %v653_v21 = vld [vmem:[#allocation10 + $0x28] sm:$0xff]  ;;  %v554_v22 = vld [vmem:[#allocation8 + $0x20] sm:$0xff]  ;;  %s5658_s12 = sld [smem:[#allocation29_spill]]  ;;  %s3671_s26 = scalar_lea.sflag [#allocation4], %s5155_s20 }
  0xbb   : > { %4101 = vmatprep.subr.mxu1 %v660_v7  ;;  %4067 = vmatpush3.msra.mxu0 %v562_v6  ;;  %v652_v23 = vld [vmem:[#allocation10 + $0x20] sm:$0xff]  ;;  %v553_v24 = vld [vmem:[#allocation8 + $0x18] sm:$0xff]  ;;  %v552_v26 = vld [vmem:[#allocation8 + $0x10] sm:$0xff]  ;;  %s4853_s21 = smov [#allocation14]  }
  0xbc   : > { %4102 = vmatpush3.msra.mxu1 %v660_v7  ;;  %4068 = vmatprep.subr.mxu0 %v561_v8  ;;  %v651_v25 = vld [vmem:[#allocation10 + $0x18] sm:$0xff]  ;;  %v650_v27 = vld [vmem:[#allocation10 + $0x10] sm:$0xff]  ;;  %v551_v28 = vld [vmem:[#allocation8 + $0x8] sm:$0xff]  ;;  %s4761_s22 = sshll.u32 %s4853_s21, 4  ;;  %s4762_s22 = int_to_ptr.vmem [resolvable:$false] %s4761_s22 }
  0xbd   : > { %4103 = vmatprep.subr.mxu1 %v659_v9  ;;  %4069 = vmatpush3.msra.mxu0 %v561_v8  ;;  %v649_v29 = vld [vmem:[#allocation10 + $0x8] sm:$0xff]  ;;  %v550_v30 = vld [vmem:[#allocation8] sm:$0xff]  ;;  %v761_v47 = vld [vmem:[#allocation11 + $0x78] sm:$0xff] }
  0xbe   : > { %4104 = vmatpush3.msra.mxu1 %v659_v9  ;;  %4070 = vmatprep.subr.mxu0 %v560_v10  ;;  %v648_v31 = vld [vmem:[#allocation10] sm:$0xff]  ;;  %v545_v34 = vld [vmem:[%s457_s15 + $0x8] sm:$0xff]  ;;  %v760_v48 = vld [vmem:[#allocation11 + $0x70] sm:$0xff] }
  0xbf   : > { %4105 = vmatprep.subr.mxu1 %v658_v11  ;;  %4071 = vmatpush3.msra.mxu0 %v560_v10  ;;  %v544_v32 = vld [vmem:[%s457_s15] sm:$0xff]  ;;  %v547_v35 = vld [vmem:[%s466_s11 + $0x8] sm:$0xff]  ;;  %p5659_p5 = scmp.ne.s32.totalorder %s5657_s25, 0 }
  0xc0   : > { %4106 = vmatpush3.msra.mxu1 %v658_v11  ;;  %4072 = vmatprep.subr.mxu0 %v559_v12  ;;  %v546_v33 = vld [vmem:[%s466_s11] sm:$0xff]  ;;  %v759_v49 = vld [vmem:[#allocation11 + $0x68] sm:$0xff]  ;;  %v757_v52 = vld [vmem:[#allocation11 + $0x58] sm:$0xff]  ;;  %s539_s11 = scalar_lea.vmem [#allocation14], %s5158_s16 }
  0xc1   : > { %4107 = vmatprep.subr.mxu1 %v657_v13  ;;  %4073 = vmatpush3.msra.mxu0 %v559_v12  ;;  %v3863_v38 = vld [vmem:[%s5597_s4] ss:$0 sm:$0xff]  ;;  %v756_v53 = vld [vmem:[#allocation11 + $0x50] sm:$0xff]  ;;  %v755_v54 = vld [vmem:[#allocation11 + $0x48] sm:$0xff] }
  0xc2   : > { %4108 = vmatpush3.msra.mxu1 %v657_v13  ;;  %4074 = vmatprep.subr.mxu0 %v558_v14  ;;  %v3864_v40 = vld [vmem:[%s5599_s6] ss:$0 sm:$0xff]  ;;  %v753_v56 = vld [vmem:[#allocation11 + $0x38] sm:$0xff]  ;;  %v752_v57 = vld [vmem:[#allocation11 + $0x30] sm:$0xff] }
  0xc3   : > { %4109 = vmatprep.subr.mxu1 %v656_v15  ;;  %4075 = vmatpush3.msra.mxu0 %v558_v14  ;;  %v758_v50 = vld [vmem:[#allocation11 + $0x60] sm:$0xff]  ;;  %v751_v58 = vld [vmem:[#allocation11 + $0x28] sm:$0xff]  ;;  %v749_v60 = vld [vmem:[#allocation11 + $0x18] sm:$0xff] }
  0xc4   : > { %4110 = vmatpush3.msra.mxu1 %v656_v15  ;;  %4076 = vmatprep.subr.mxu0 %v557_v16  ;;  %v548_v51 = vld [vmem:[%s475_s17] sm:$0xff]  ;;  %v747_v62 = vld [vmem:[#allocation11 + $0x8] sm:$0xff] }
  0xc5   : > { %4111 = vmatprep.subr.mxu1 %v655_v17  ;;  %4077 = vmatpush3.msra.mxu0 %v557_v16  ;;  %v754_v55 = vld [vmem:[#allocation11 + $0x40] sm:$0xff]  ;;  %v748_v61 = vld [vmem:[#allocation11 + $0x10] sm:$0xff]  ;;  %v549_v0 = vld [vmem:[%s475_s17 + $0x8] sm:$0xff]  ;;  %s3684_s17 = sshll.u32 %s539_s11, 4  ;;  %s5545_s17 = int_to_ptr.vmem [resolvable:$true] %s3684_s17 }
  0xc6   : > { %4112 = vmatpush3.msra.mxu1 %v655_v17  ;;  %4078 = vmatprep.subr.mxu0 %v556_v18  ;;  %v750_v59 = vld [vmem:[#allocation11 + $0x20] sm:$0xff]  ;;  %s4757_s16 = scalar_lea.vmem %s5545_s17, 256  ;;  %p4764_p11 = scmp.lt.s32.totalorder %s5545_s17, %s4762_s22 }
  0xc7   : > { %4113 = vmatprep.subr.mxu1 %v654_v19  ;;  %4079 = vmatpush3.msra.mxu0 %v556_v18  ;;  %v746_v63 = vld [vmem:[#allocation11] sm:$0xff]  ;;  %p4758_p12 = scmp.ne.s32.totalorder %s5545_s17, %s4757_s16 }
  0xc8   : > { %4114 = vmatpush3.msra.mxu1 %v654_v19  ;;  %4080 = vmatprep.subr.mxu0 %v555_v20 }
  0xc9   : > { %4115 = vmatprep.subr.mxu1 %v653_v21  ;;  %4081 = vmatpush3.msra.mxu0 %v555_v20  ;;  %v3865_v20 = vld [vmem:[%s5601_s8] ss:$0 sm:$0xff]  ;;  %p4759_p4 = pnand %p4758_p12, %p5659_p5 }
  0xca   : > { %4116 = vmatpush3.msra.mxu1 %v653_v21  ;;  %4082 = vmatprep.subr.mxu0 %v554_v22 }
  0xcb   : > { %4117 = vmatprep.subr.mxu1 %v652_v23  ;;  %4083 = vmatpush3.msra.mxu0 %v554_v22  ;;  %p4760_p8 = pneg %p4759_p4 }
  0xcc   : > { %4118 = vmatpush3.msra.mxu1 %v652_v23  ;;  %4084 = vmatprep.subr.mxu0 %v553_v24 }
  0xcd   : > { %4119 = vmatprep.subr.mxu1 %v651_v25  ;;  %4085 = vmatpush3.msra.mxu0 %v553_v24 }
  0xce   : > { %4120 = vmatpush3.msra.mxu1 %v651_v25  ;;  %4086 = vmatprep.subr.mxu0 %v552_v26 }
  0xcf   : > { %4121 = vmatprep.subr.mxu1 %v650_v27  ;;  %4087 = vmatpush3.msra.mxu0 %v552_v26 }
  0xd0   : > { %4122 = vmatpush3.msra.mxu1 %v650_v27  ;;  %4088 = vmatprep.subr.mxu0 %v551_v28 }
  0xd1   : > { %4123 = vmatprep.subr.mxu1 %v649_v29  ;;  %4089 = vmatpush3.msra.mxu0 %v551_v28 }
  0xd2   : > { %4124 = vmatpush3.msra.mxu1 %v649_v29  ;;  %4090 = vmatprep.subr.mxu0 %v550_v30 }
  0xd3   : > { %4125 = vmatprep.subr.mxu1 %v648_v31  ;;  %4091 = vmatpush3.msra.mxu0 %v550_v30 }
  0xd4   : > { %4092 = vmatprep.mubr.f32.mxu0 %v544_v32  ;;  %4126 = vmatpush3.msra.mxu1 %v648_v31 }
  0xd5   : > { %4127 = vmatprep.mubr.f32.mxu1 %v546_v33  ;;  %4093 = vmatmul.mubr.f32.vlgmr.msra.gmra.mxu0 %v545_v34 }
  0xd6   : > { %4128 = vmatmul.mubr.f32.vlgmr.msra.gmra.mxu1 %v547_v35  ;;  %4165 = vmatprep.subr.mxu1 %v4844_v36 }
  0xd7   : > { %4167 = vmatprep.mubr.msk.f32.mxu1 %vm4845_vm0, %v4844_v36  ;;  %4130 = vmatprep.subr.mxu0 %v761_v47 }
  0xd8   : > { %4131 = vmatpush3.msra.mxu0 %v761_v47  ;;  %4162 = vmatprep.mubr.f32.mxu0 %v548_v51 }
  0xd9   : > { %4132 = vmatprep.subr.mxu0 %v760_v48 }
  0xda   : > { %4133 = vmatpush3.msra.mxu0 %v760_v48 }
  0xdb   : > { %4134 = vmatprep.subr.mxu0 %v759_v49 }
  0xdc   : > { %4135 = vmatpush3.msra.mxu0 %v759_v49 }
  0xdd   : > { %4136 = vmatprep.subr.mxu0 %v758_v50 }
  0xde   : > { %4137 = vmatpush3.msra.mxu0 %v758_v50 }
  0xdf   : > { %4138 = vmatprep.subr.mxu0 %v757_v52 }
  0xe0   : > { %4139 = vmatpush3.msra.mxu0 %v757_v52 }
  0xe1   : > { %4140 = vmatprep.subr.mxu0 %v756_v53 }
  0xe2   : > { %4141 = vmatpush3.msra.mxu0 %v756_v53 }
  0xe3   : > { %4142 = vmatprep.subr.mxu0 %v755_v54 }
  0xe4   : > { %4143 = vmatpush3.msra.mxu0 %v755_v54 }
  0xe5   : > { %4144 = vmatprep.subr.mxu0 %v754_v55 }
  0xe6   : > { %4145 = vmatpush3.msra.mxu0 %v754_v55 }
  0xe7   : > { %4146 = vmatprep.subr.mxu0 %v753_v56 }
  0xe8   : > { %4147 = vmatpush3.msra.mxu0 %v753_v56 }
  0xe9   : > { %4148 = vmatprep.subr.mxu0 %v752_v57 }
  0xea   : > { %4149 = vmatpush3.msra.mxu0 %v752_v57 }
  0xeb   : > { %4150 = vmatprep.subr.mxu0 %v751_v58 }
  0xec   : > { %4151 = vmatpush3.msra.mxu0 %v751_v58 }
  0xed   : > { %4152 = vmatprep.subr.mxu0 %v750_v59 }
  0xee   : > { %4153 = vmatpush3.msra.mxu0 %v750_v59 }
  0xef   : > { %4154 = vmatprep.subr.mxu0 %v749_v60 }
  0xf0   : > { %4155 = vmatpush3.msra.mxu0 %v749_v60 }
  0xf1   : > { %4156 = vmatprep.subr.mxu0 %v748_v61 }
  0xf2   : > { %4157 = vmatpush3.msra.mxu0 %v748_v61 }
  0xf3   : > { %4158 = vmatprep.subr.mxu0 %v747_v62 }
  0xf4   : > { %4159 = vmatpush3.msra.mxu0 %v747_v62 }
  0xf5   : > { %4160 = vmatprep.subr.mxu0 %v746_v63 }
  0xf6   : > { %4161 = vmatpush3.msra.mxu0 %v746_v63 }
  0xf7   : > { %4163 = vmatmul.mubr.f32.vlgmr.msra.gmra.mxu0 %v549_v0  ;;  %4245 = vmatprep.subr.mxu0 %v4844_v36 }
  0xf8   : > { %4247 = vmatprep.mubr.msk.f32.mxu0 %vm4845_vm0, %v4844_v36 }
 0x195   : > { %v4094_v37 = vpop.f32.mrf.mxu0 }
 0x196   : > { %v4129_v39 = vpop.f32.mrf.mxu1  ;;  %v5215_v46 = vadd.f32 %v4094_v37, %v3863_v38 }
 0x197   : > { %v639_v41 = vpop.f32.mrf.mxu0  ;;  %v5207_v45 = vadd.f32 %v4129_v39, %v3864_v40 }
 0x198   : > { %v737_v42 = vpop.f32.mrf.mxu1  ;;  %v5198_v43 = vadd.f32 %v3863_v38, %v639_v41 }
 0x199   : > { %v5200_v44 = vadd.f32 %v3864_v40, %v737_v42 }
 0x19a   : > { %1168 = vrot.lane.b32.xlu1 %v5198_v43, %s4846_s3 }
 0x19b   : > { %4166 = vmatpush3.xpose.msk.msra.mxu1 %vm844_vm1, %v5200_v44 }
 0x19c   : > { %4170 = vmatprep.subr.mxu1 %v4844_v36 }
 0x19e   : > { %4168 = vmatmul.mubr.msk.f32.vlgmr.msra.gmra.mxu1 %vm844_vm1, %v5198_v43  ;;  %1248 = vrot.lane.b32.xlu1 %v5207_v45, %s4846_s3 }
 0x19f   : > { %4171 = vmatpush3.xpose.msk.msra.mxu1 %vm844_vm1, %v5207_v45  ;;  %4172 = vmatprep.mubr.msk.f32.mxu1 %vm4845_vm0, %v4844_v36 }
 0x1a0   : > { %4175 = vmatprep.subr.mxu1 %v4844_v36 }
 0x1a2   : > { %4173 = vmatmul.mubr.msk.f32.vlgmr.msra.gmra.mxu1 %vm844_vm1, %v5215_v46 }
 0x1a3   : > { %4177 = vmatprep.mubr.msk.f32.mxu1 %vm4845_vm0, %v4844_v36 }
 0x1b7   : > { %v4164_v19 = vpop.f32.mrf.mxu0 }
 0x1b8   : > { %v5240_v21 = vadd.f32 %v4164_v19, %v3865_v20 }
 0x1b9   : > { %v835_v22 = vpop.f32.mrf.mxu0 }
 0x1ba   : > { %v5242_v23 = vadd.f32 %v3865_v20, %v835_v22 }
 0x1bc   : > { %4176 = vmatpush3.msra.mxu1 %v5242_v23 }
 0x1bd   : > { %4180 = vmatprep.subr.mxu1 %v4844_v36 }
 0x20c   : > { %v1169_v24 = vpop.permute.xlu1 %1168 }
 0x210   : > { %v1249_v25 = vpop.permute.xlu1 %1248 }
 0x25e   : > { %v917_v1 = vpop.f32.mrf.mxu1 }
 0x25f   : > { %v997_v2 = vmul.f32 0.25, %v917_v1 }
 0x260   : > { %v4169_v3 = vpop.f32.mrf.mxu1 }
 0x261   : > { %v1000_v4 = vsel %vm999_vm2, %v997_v2, -inf }
 0x262   : > { %1001 = vmax.xlane.f32.xlu0 %v1000_v4  ;;  %v993_v5 = vpop.f32.mrf.mxu1 }
 0x263   : > { %v998_v6 = vmul.f32 0.25, %v993_v5 }
 0x264   : > { %v4174_v7 = vpop.f32.mrf.mxu1 }
 0x265   : > { %v1003_v8 = vsel %vm999_vm2, %v998_v6, -inf }
 0x266   : > { %1004 = vmax.xlane.f32.xlu0 %v1003_v8 }
 0x27c   : > { %1170 = vrot.lane.b32.xlu0 %v5200_v44, %s4846_s3 }
 0x2eb   : > { %v1002_v9 = vpop.xlane.xlu0 %1001 }
 0x2ec   : > { %v1006_v10 = vsub.f32 %v997_v2, %v1002_v9 }
 0x2ee   : > { %v1008_v11 = vmul.f32 1.442695, %v1006_v10 }
 0x2ef   : > { %v1005_v12 = vpop.xlane.xlu0 %1004 }
 0x2f0   : > { %4505 = vpow2.f32 %v1008_v11  ;;  %v1007_v13 = vsub.f32 %v998_v6, %v1005_v12 }
 0x2f2   : > { %v1010_v14 = vmul.f32 1.442695, %v1007_v13 }
 0x2f3   : > { %v1171_v32 = vpop.permute.xlu0 %1170 }
 0x2f4   : > { %4507 = vpow2.f32 %v1010_v14 }
 0x2fd   : > { %v4506_v15 = vpop.eup %4505 }
 0x2fe   : > { %v1012_v16 = vsel %vm999_vm2, %v4506_v15, 0.0 }
 0x2ff   : > { %1013 = vadd.xlane.f32.xlu1 %v1012_v16 }
 0x301   : > { %v4508_v17 = vpop.eup %4507 }
 0x302   : > { %v1015_v18 = vsel %vm999_vm2, %v4508_v17, 0.0 }
 0x303   : > { %1016 = vadd.xlane.f32.xlu1 %v1015_v18 }
 0x314   : > { %1246 = vrot.lane.b32.xlu1 %v5215_v46, %s4846_s3 }
 0x388   : > { %v1014_v26 = vpop.xlane.xlu1 %1013 }
 0x389   : > { %4509 = vrcp.f32 %v1014_v26 }
 0x38c   : > { %v1017_v27 = vpop.xlane.xlu1 %1016 }
 0x38d   : > { %4511 = vrcp.f32 %v1017_v27 }
 0x390   : > { %v1247_v33 = vpop.permute.xlu1 %1246 }
 0x396   : > { %v4510_v28 = vpop.eup %4509 }
 0x397   : > { %v1019_v29 = vmul.f32 %v4510_v28, %v4506_v15 }
 0x399   : > { %4178 = vmatmul.mubr.msk.f32.vlgmr.msra.gmra.mxu1 %vm999_vm2, %v1019_v29 }
 0x39a   : > { %v4512_v30 = vpop.eup %4511  ;;  %4181 = vmatpush3.msra.mxu1 %v5240_v21  ;;  %4182 = vmatprep.mubr.msk.f32.mxu1 %vm4845_vm0, %v4844_v36 }
 0x39b   : > { %4185 = vmatprep.subr.mxu1 %v4844_v36  ;;  %v1021_v31 = vmul.f32 %v4512_v30, %v4508_v17 }
 0x39d   : > { %4183 = vmatmul.mubr.msk.f32.vlgmr.msra.gmra.mxu1 %vm999_vm2, %v1021_v31 }
 0x39e   : > { %4186 = vmatpush3.xpose.msk.msra.mxu1 %vm844_vm1, %v1171_v32  ;;  %4187 = vmatprep.mubr.msk.f32.mxu1 %vm4845_vm0, %v4844_v36 }
 0x39f   : > { %4190 = vmatprep.subr.mxu1 %v4844_v36 }
 0x3a1   : > { %4188 = vmatmul.mubr.msk.f32.vlgmr.msra.gmra.mxu1 %vm844_vm1, %v1169_v24 }
 0x3a2   : > { %4191 = vmatpush3.xpose.msk.msra.mxu1 %vm844_vm1, %v1249_v25  ;;  %4192 = vmatprep.mubr.msk.f32.mxu1 %vm4845_vm0, %v4844_v36 }
 0x3a3   : > { %4195 = vmatprep.subr.mxu1 %v4844_v36 }
 0x3a5   : > { %4193 = vmatmul.mubr.msk.f32.vlgmr.msra.gmra.mxu1 %vm844_vm1, %v1247_v33 }
 0x3a6   : > { %4197 = vmatprep.mubr.msk.f32.mxu1 %vm4845_vm0, %v4844_v36 }
 0x459   : > { %v5266_v34 = vpop.f32.mrf.mxu1 }
 0x45b   : > { %v4179_v35 = vpop.f32.mrf.mxu1 }
 0x45d   : > { %v5268_v37 = vpop.f32.mrf.mxu1 }
 0x45f   : > { %v4184_v38 = vpop.f32.mrf.mxu1 }
 0x461   : > { %v1242_v39 = vpop.f32.mrf.mxu1 }
 0x462   : > { %v1324_v40 = vmul.f32 0.25, %v1242_v39 }
 0x463   : > { %v4189_v41 = vpop.f32.mrf.mxu1 }
 0x464   : > { %v1326_v42 = vsel %vm999_vm2, %v1324_v40, -inf }
 0x465   : > { %1327 = vmax.xlane.f32.xlu0 %v1326_v42  ;;  %v1320_v47 = vpop.f32.mrf.mxu1 }
 0x466   : > { %v1325_v48 = vmul.f32 0.25, %v1320_v47 }
 0x467   : > { %v4194_v49 = vpop.f32.mrf.mxu1 }
 0x468   : > { %v1329_v50 = vsel %vm999_vm2, %v1325_v48, -inf }
 0x469   : > { %1330 = vmax.xlane.f32.xlu1 %v1329_v50 }
 0x47a   : > { %1426 = vrot.lane.b32.xlu1 %v5240_v21, %s4846_s3 }
 0x47e   : > { %1504 = vrot.lane.b32.xlu1 %v5200_v44, %s4847_s13 }
 0x482   : > { %1502 = vrot.lane.b32.xlu1 %v5198_v43, %s4847_s13 }
 0x486   : > { %1580 = vrot.lane.b32.xlu1 %v5215_v46, %s4847_s13 }
 0x4ee   : > { %v1328_v51 = vpop.xlane.xlu0 %1327 }
 0x4ef   : > { %v1332_v52 = vsub.f32 %v1324_v40, %v1328_v51 }
 0x4f1   : > { %v1334_v53 = vmul.f32 1.442695, %v1332_v52 }
 0x4f2   : > { %v1331_v54 = vpop.xlane.xlu1 %1330 }
 0x4f3   : > { %4513 = vpow2.f32 %v1334_v53  ;;  %v1333_v55 = vsub.f32 %v1325_v48, %v1331_v54 }
 0x4f5   : > { %v1336_v56 = vmul.f32 1.442695, %v1333_v55 }
 0x4f6   : > { %v1427_v0 = vpop.permute.xlu1 %1426 }
 0x4f7   : > { %4515 = vpow2.f32 %v1336_v56 }
 0x4fa   : > { %v1505_v3 = vpop.permute.xlu1 %1504 }
 0x4fe   : > { %v1503_v6 = vpop.permute.xlu1 %1502 }
 0x500   : > { %v4514_v57 = vpop.eup %4513 }
 0x501   : > { %v1338_v58 = vsel %vm999_vm2, %v4514_v57, 0.0 }
 0x502   : > { %1339 = vadd.xlane.f32.xlu0 %v1338_v58  ;;  %v1581_v8 = vpop.permute.xlu1 %1580 }
 0x504   : > { %v4516_v59 = vpop.eup %4515 }
 0x505   : > { %v1341_v60 = vsel %vm999_vm2, %v4516_v59, 0.0 }
 0x506   : > { %1342 = vadd.xlane.f32.xlu0 %v1341_v60 }
 0x51c   : > { %1349 = vrot.lane.b32.xlu0 %v5242_v23, %s4846_s3 }
 0x520   : > { %1582 = vrot.lane.b32.xlu0 %v5207_v45, %s4847_s13 }
 0x58b   : > { %v1340_v61 = vpop.xlane.xlu0 %1339 }
 0x58c   : > { %4517 = vrcp.f32 %v1340_v61 }
 0x58f   : > { %v1343_v62 = vpop.xlane.xlu0 %1342 }
 0x590   : > { %4519 = vrcp.f32 %v1343_v62 }
 0x593   : > { %v1350_v63 = vpop.permute.xlu0 %1349 }
 0x594   : > { %4196 = vmatpush3.msra.mxu1 %v1350_v63 }
 0x595   : > { %4200 = vmatprep.subr.mxu1 %v4844_v36 }
 0x597   : > { %v1583_v7 = vpop.permute.xlu0 %1582 }
 0x599   : > { %v4518_v1 = vpop.eup %4517 }
 0x59a   : > { %v1345_v2 = vmul.f32 %v4518_v1, %v4514_v57 }
 0x59c   : > { %4198 = vmatmul.mubr.msk.f32.vlgmr.msra.gmra.mxu1 %vm999_vm2, %v1345_v2 }
 0x59d   : > { %v4520_v4 = vpop.eup %4519  ;;  %4201 = vmatpush3.msra.mxu1 %v1427_v0  ;;  %4202 = vmatprep.mubr.msk.f32.mxu1 %vm4845_vm0, %v4844_v36 }
 0x59e   : > { %4205 = vmatprep.subr.mxu1 %v4844_v36  ;;  %v1347_v5 = vmul.f32 %v4520_v4, %v4516_v59 }
 0x5a0   : > { %4203 = vmatmul.mubr.msk.f32.vlgmr.msra.gmra.mxu1 %vm999_vm2, %v1347_v5 }
 0x5a1   : > { %4206 = vmatpush3.xpose.msk.msra.mxu1 %vm844_vm1, %v1505_v3  ;;  %4207 = vmatprep.mubr.msk.f32.mxu1 %vm4845_vm0, %v4844_v36 }
 0x5a2   : > { %4210 = vmatprep.subr.mxu1 %v4844_v36 }
 0x5a4   : > { %4208 = vmatmul.mubr.msk.f32.vlgmr.msra.gmra.mxu1 %vm844_vm1, %v1503_v6 }
 0x5a5   : > { %4211 = vmatpush3.xpose.msk.msra.mxu1 %vm844_vm1, %v1583_v7  ;;  %4212 = vmatprep.mubr.msk.f32.mxu1 %vm4845_vm0, %v4844_v36 }
 0x5a6   : > { %4215 = vmatprep.subr.mxu1 %v4844_v36 }
 0x5a8   : > { %4213 = vmatmul.mubr.msk.f32.vlgmr.msra.gmra.mxu1 %vm844_vm1, %v1581_v8 }
 0x5a9   : > { %4217 = vmatprep.mubr.msk.f32.mxu1 %vm4845_vm0, %v4844_v36 }
 0x65c   : > { %v5304_v9 = vpop.f32.mrf.mxu1 }
 0x65e   : > { %v4199_v10 = vpop.f32.mrf.mxu1 }
 0x660   : > { %v5306_v11 = vpop.f32.mrf.mxu1 }
 0x661   : > { %v4470_v12 = vpack.i.bf16 %v5306_v11, %v5304_v9 }
 0x662   : > { %v4204_v13 = vpop.f32.mrf.mxu1 }
 0x664   : > { %v1576_v14 = vpop.f32.mrf.mxu1 }
 0x665   : > { %v1658_v15 = vmul.f32 0.25, %v1576_v14 }
 0x666   : > { %v4209_v16 = vpop.f32.mrf.mxu1 }
 0x667   : > { %v1660_v17 = vsel %vm999_vm2, %v1658_v15, -inf }
 0x668   : > { %1661 = vmax.xlane.f32.xlu0 %v1660_v17  ;;  %v1654_v18 = vpop.f32.mrf.mxu1 }
 0x669   : > { %v1659_v19 = vmul.f32 0.25, %v1654_v18 }
 0x66a   : > { %v4214_v20 = vpop.f32.mrf.mxu1 }
 0x66b   : > { %v1663_v22 = vsel %vm999_vm2, %v1659_v19, -inf }
 0x66c   : > { %1664 = vmax.xlane.f32.xlu1 %v1663_v22 }
 0x67d   : > { %1758 = vrot.lane.b32.xlu1 %v5240_v21, %s4847_s13 }
 0x681   : > { %1836 = vrot.lane.b32.xlu1 %v5200_v44, %s4848_s30 }
 0x685   : > { %1834 = vrot.lane.b32.xlu1 %v5198_v43, %s4848_s30 }
 0x689   : > { %1912 = vrot.lane.b32.xlu1 %v5215_v46, %s4848_s30 }
 0x6f1   : > { %v1662_v24 = vpop.xlane.xlu0 %1661 }
 0x6f2   : > { %v1666_v25 = vsub.f32 %v1658_v15, %v1662_v24 }
 0x6f4   : > { %v1668_v26 = vmul.f32 1.442695, %v1666_v25 }
 0x6f5   : > { %v1665_v27 = vpop.xlane.xlu1 %1664 }
 0x6f6   : > { %4521 = vpow2.f32 %v1668_v26  ;;  %v1667_v28 = vsub.f32 %v1659_v19, %v1665_v27 }
 0x6f8   : > { %v1670_v29 = vmul.f32 1.442695, %v1667_v28 }
 0x6f9   : > { %v1759_v40 = vpop.permute.xlu1 %1758 }
 0x6fa   : > { %4523 = vpow2.f32 %v1670_v29 }
 0x6fd   : > { %v1837_v47 = vpop.permute.xlu1 %1836 }
 0x701   : > { %v1835_v50 = vpop.permute.xlu1 %1834 }
 0x703   : > { %v4522_v30 = vpop.eup %4521 }
 0x704   : > { %v1672_v31 = vsel %vm999_vm2, %v4522_v30, 0.0 }
 0x705   : > { %1673 = vadd.xlane.f32.xlu0 %v1672_v31  ;;  %v1913_v52 = vpop.permute.xlu1 %1912 }
 0x707   : > { %v4524_v32 = vpop.eup %4523 }
 0x708   : > { %v1675_v33 = vsel %vm999_vm2, %v4524_v32, 0.0 }
 0x709   : > { %1676 = vadd.xlane.f32.xlu0 %v1675_v33 }
 0x71f   : > { %1682 = vrot.lane.b32.xlu0 %v5242_v23, %s4847_s13 }
 0x723   : > { %1914 = vrot.lane.b32.xlu0 %v5207_v45, %s4848_s30 }
 0x78e   : > { %v1674_v35 = vpop.xlane.xlu0 %1673 }
 0x78f   : > { %4525 = vrcp.f32 %v1674_v35 }
 0x792   : > { %v1677_v38 = vpop.xlane.xlu0 %1676 }
 0x793   : > { %4527 = vrcp.f32 %v1677_v38 }
 0x796   : > { %v1683_v39 = vpop.permute.xlu0 %1682 }
 0x797   : > { %4216 = vmatpush3.msra.mxu1 %v1683_v39 }
 0x798   : > { %4220 = vmatprep.subr.mxu1 %v4844_v36 }
 0x79a   : > { %v1915_v51 = vpop.permute.xlu0 %1914 }
 0x79c   : > { %v4526_v41 = vpop.eup %4525 }
 0x79d   : > { %v1679_v42 = vmul.f32 %v4526_v41, %v4522_v30 }
 0x79f   : > { %4218 = vmatmul.mubr.msk.f32.vlgmr.msra.gmra.mxu1 %vm999_vm2, %v1679_v42 }
 0x7a0   : > { %v4528_v48 = vpop.eup %4527  ;;  %4221 = vmatpush3.msra.mxu1 %v1759_v40  ;;  %4222 = vmatprep.mubr.msk.f32.mxu1 %vm4845_vm0, %v4844_v36 }
 0x7a1   : > { %4225 = vmatprep.subr.mxu1 %v4844_v36  ;;  %v1681_v49 = vmul.f32 %v4528_v48, %v4524_v32 }
 0x7a3   : > { %4223 = vmatmul.mubr.msk.f32.vlgmr.msra.gmra.mxu1 %vm999_vm2, %v1681_v49 }
 0x7a4   : > { %4226 = vmatpush3.xpose.msk.msra.mxu1 %vm844_vm1, %v1837_v47  ;;  %4227 = vmatprep.mubr.msk.f32.mxu1 %vm4845_vm0, %v4844_v36 }
 0x7a5   : > { %4230 = vmatprep.subr.mxu1 %v4844_v36 }
 0x7a7   : > { %4228 = vmatmul.mubr.msk.f32.vlgmr.msra.gmra.mxu1 %vm844_vm1, %v1835_v50 }
 0x7a8   : > { %4231 = vmatpush3.xpose.msk.msra.mxu1 %vm844_vm1, %v1915_v51  ;;  %4232 = vmatprep.mubr.msk.f32.mxu1 %vm4845_vm0, %v4844_v36 }
 0x7a9   : > { %4235 = vmatprep.subr.mxu1 %v4844_v36 }
 0x7ab   : > { %4233 = vmatmul.mubr.msk.f32.vlgmr.msra.gmra.mxu1 %vm844_vm1, %v1913_v52 }
 0x7ac   : > { %4237 = vmatprep.mubr.msk.f32.mxu1 %vm4845_vm0, %v4844_v36 }
 0x85f   : > { %v5344_v53 = vpop.f32.mrf.mxu1 }
 0x861   : > { %v4219_v54 = vpop.f32.mrf.mxu1 }
 0x863   : > { %v5346_v55 = vpop.f32.mrf.mxu1 }
 0x864   : > { %v4475_v56 = vpack.i.bf16 %v5346_v55, %v5344_v53 }
 0x865   : > { %v4224_v57 = vpop.f32.mrf.mxu1 }
 0x867   : > { %v1908_v58 = vpop.f32.mrf.mxu1 }
 0x868   : > { %v1990_v59 = vmul.f32 0.25, %v1908_v58 }
 0x869   : > { %v4229_v60 = vpop.f32.mrf.mxu1 }
 0x86a   : > { %v1992_v61 = vsel %vm999_vm2, %v1990_v59, -inf }
 0x86b   : > { %1993 = vmax.xlane.f32.xlu0 %v1992_v61  ;;  %v1986_v62 = vpop.f32.mrf.mxu1 }
 0x86c   : > { %v1991_v63 = vmul.f32 0.25, %v1986_v62 }
 0x86d   : > { %v4234_v0 = vpop.f32.mrf.mxu1 }
 0x86e   : > { %v1995_v1 = vsel %vm999_vm2, %v1991_v63, -inf }
 0x86f   : > { %1996 = vmax.xlane.f32.xlu1 %v1995_v1 }
 0x880   : > { %2090 = vrot.lane.b32.xlu1 %v5240_v21, %s4848_s30 }
 0x881   : > { %2014 = vrot.lane.b32.xlu0 %v5242_v23, %s4848_s30 }
 0x884   : > { %2168 = vrot.lane.b32.xlu1 %v5200_v44, %s4849_s29 }
 0x888   : > { %2246 = vrot.lane.b32.xlu1 %v5207_v45, %s4849_s29 }
 0x88c   : > { %2244 = vrot.lane.b32.xlu1 %v5215_v46, %s4849_s29 }
 0x8f4   : > { %v1994_v2 = vpop.xlane.xlu0 %1993 }
 0x8f5   : > { %v1998_v3 = vsub.f32 %v1990_v59, %v1994_v2 }
 0x8f7   : > { %v2000_v4 = vmul.f32 1.442695, %v1998_v3 }
 0x8f8   : > { %v2015_v5 = vpop.permute.xlu0 %2014  ;;  %v1997_v6 = vpop.xlane.xlu1 %1996 }
 0x8f9   : > { %4529 = vpow2.f32 %v2000_v4  ;;  %v1999_v7 = vsub.f32 %v1991_v63, %v1997_v6  ;;  %4236 = vmatpush3.msra.mxu1 %v2015_v5 }
 0x8fa   : > { %4240 = vmatprep.subr.mxu1 %v4844_v36 }
 0x8fb   : > { %v2002_v8 = vmul.f32 1.442695, %v1999_v7 }
 0x8fc   : > { %v2091_v10 = vpop.permute.xlu1 %2090 }
 0x8fd   : > { %4531 = vpow2.f32 %v2002_v8 }
 0x900   : > { %v2169_v13 = vpop.permute.xlu1 %2168 }
 0x901   : > { %4246 = vmatpush3.xpose.msk.msra.mxu0 %vm844_vm1, %v2169_v13 }
 0x902   : > { %4255 = vmatprep.subr.mxu0 %v4844_v36 }
 0x904   : > { %v2247_v26 = vpop.permute.xlu1 %2246 }
 0x906   : > { %v4530_v14 = vpop.eup %4529 }
 0x907   : > { %v2004_v15 = vsel %vm999_vm2, %v4530_v14, 0.0 }
 0x908   : > { %2005 = vadd.xlane.f32.xlu0 %v2004_v15  ;;  %v2245_v28 = vpop.permute.xlu1 %2244 }
 0x90a   : > { %v4532_v16 = vpop.eup %4531 }
 0x90b   : > { %v2007_v17 = vsel %vm999_vm2, %v4532_v16, 0.0 }
 0x90c   : > { %2008 = vadd.xlane.f32.xlu0 %v2007_v17 }
 0x922   : > { %2166 = vrot.lane.b32.xlu0 %v5198_v43, %s4849_s29 }
 0x991   : > { %v2006_v18 = vpop.xlane.xlu0 %2005 }
 0x992   : > { %4533 = vrcp.f32 %v2006_v18 }
 0x995   : > { %v2009_v19 = vpop.xlane.xlu0 %2008 }
 0x996   : > { %4535 = vrcp.f32 %v2009_v19 }
 0x999   : > { %v2167_v20 = vpop.permute.xlu0 %2166 }
 0x99a   : > { %4248 = vmatmul.mubr.msk.f32.vlgmr.msra.gmra.mxu0 %vm844_vm1, %v2167_v20 }
 0x99b   : > { %4257 = vmatprep.mubr.msk.f32.mxu0 %vm4845_vm0, %v4844_v36 }
 0x99f   : > { %v4534_v22 = vpop.eup %4533 }
 0x9a0   : > { %v2011_v24 = vmul.f32 %v4534_v22, %v4530_v14 }
 0x9a2   : > { %4238 = vmatmul.mubr.msk.f32.vlgmr.msra.gmra.mxu1 %vm999_vm2, %v2011_v24 }
 0x9a3   : > { %v4536_v25 = vpop.eup %4535  ;;  %4241 = vmatpush3.msra.mxu1 %v2091_v10  ;;  %4242 = vmatprep.mubr.msk.f32.mxu1 %vm4845_vm0, %v4844_v36 }
 0x9a4   : > { %4250 = vmatprep.subr.mxu1 %v4844_v36  ;;  %v2013_v27 = vmul.f32 %v4536_v25, %v4532_v16 }
 0x9a6   : > { %4243 = vmatmul.mubr.msk.f32.vlgmr.msra.gmra.mxu1 %vm999_vm2, %v2013_v27 }
 0x9a7   : > { %4251 = vmatpush3.xpose.msk.msra.mxu1 %vm844_vm1, %v2247_v26  ;;  %4252 = vmatprep.mubr.msk.f32.mxu1 %vm4845_vm0, %v4844_v36 }
 0x9a8   : > { %4260 = vmatprep.subr.mxu1 %v4844_v36 }
 0x9aa   : > { %4253 = vmatmul.mubr.msk.f32.vlgmr.msra.gmra.mxu1 %vm844_vm1, %v2245_v28 }
 0x9ab   : > { %4262 = vmatprep.mubr.msk.f32.mxu1 %vm4845_vm0, %v4844_v36 }
 0xa5a   : > { %v2240_v29 = vpop.f32.mrf.mxu0 }
 0xa5b   : > { %v2322_v30 = vmul.f32 0.25, %v2240_v29 }
 0xa5c   : > { %v4249_v31 = vpop.f32.mrf.mxu0 }
 0xa5d   : > { %v2324_v32 = vsel %vm999_vm2, %v2322_v30, -inf }
 0xa5e   : > { %2325 = vmax.xlane.f32.xlu0 %v2324_v32 }
 0xa62   : > { %v5385_v33 = vpop.f32.mrf.mxu1 }
 0xa64   : > { %v4239_v35 = vpop.f32.mrf.mxu1 }
 0xa66   : > { %v5387_v38 = vpop.f32.mrf.mxu1 }
 0xa67   : > { %v4480_v39 = vpack.i.bf16 %v5387_v38, %v5385_v33  ;;  %v3585_v33 = vld [vmem:[#allocation13 + $0x78] sm:$0xff]  ;;  %v3584_v38 = vld [vmem:[#allocation13 + $0x70] sm:$0xff] }
 0xa68   : > { %v4244_v40 = vpop.f32.mrf.mxu1 }
 0xa6a   : > { %v2318_v41 = vpop.f32.mrf.mxu1 }
 0xa6b   : > { %v2323_v42 = vmul.f32 0.25, %v2318_v41 }
 0xa6c   : > { %v4254_v47 = vpop.f32.mrf.mxu1 }
 0xa6d   : > { %v2327_v48 = vsel %vm999_vm2, %v2323_v42, -inf }
 0xa6e   : > { %2328 = vmax.xlane.f32.xlu1 %v2327_v48 }
 0xa7f   : > { %2422 = vrot.lane.b32.xlu1 %v5240_v21, %s4849_s29 }
 0xa83   : > { %2500 = vrot.lane.b32.xlu1 %v5200_v44, %s4850_s1 }
 0xa87   : > { %2578 = vrot.lane.b32.xlu1 %v5207_v45, %s4850_s1 }
 0xa8b   : > { %2576 = vrot.lane.b32.xlu1 %v5215_v46, %s4850_s1 }
 0xae7   : > { %v2326_v49 = vpop.xlane.xlu0 %2325 }
 0xae8   : > { %v2330_v50 = vsub.f32 %v2322_v30, %v2326_v49 }
 0xaea   : > { %v2332_v51 = vmul.f32 1.442695, %v2330_v50 }
 0xaec   : > { %4537 = vpow2.f32 %v2332_v51 }
 0xaf7   : > { %v2329_v52 = vpop.xlane.xlu1 %2328 }
 0xaf8   : > { %v2331_v59 = vsub.f32 %v2323_v42, %v2329_v52 }
 0xaf9   : > { %v4538_v54 = vpop.eup %4537 }
 0xafa   : > { %v2336_v57 = vsel %vm999_vm2, %v4538_v54, 0.0  ;;  %v2334_v60 = vmul.f32 1.442695, %v2331_v59 }
 0xafb   : > { %2337 = vadd.xlane.f32.xlu0 %v2336_v57  ;;  %v2423_v58 = vpop.permute.xlu1 %2422 }
 0xafc   : > { %4261 = vmatpush3.msra.mxu1 %v2423_v58  ;;  %4539 = vpow2.f32 %v2334_v60 }
 0xafd   : > { %4270 = vmatprep.subr.mxu1 %v4844_v36 }
 0xaff   : > { %v2501_v3 = vpop.permute.xlu1 %2500 }
 0xb03   : > { %v2579_v7 = vpop.permute.xlu1 %2578 }
 0xb07   : > { %v2577_v10 = vpop.permute.xlu1 %2576 }
 0xb09   : > { %v4540_v61 = vpop.eup %4539 }
 0xb0a   : > { %v2339_v62 = vsel %vm999_vm2, %v4540_v61, 0.0 }
 0xb11   : > { %2346 = vrot.lane.b32.xlu0 %v5242_v23, %s4849_s29 }
 0xb30   : > { %2340 = vadd.xlane.f32.xlu0 %v2339_v62 }
 0xb46   : > { %2498 = vrot.lane.b32.xlu0 %v5198_v43, %s4850_s1 }
 0xb84   : > { %v2338_v63 = vpop.xlane.xlu0 %2337 }
 0xb85   : > { %4541 = vrcp.f32 %v2338_v63 }
 0xb88   : > { %v2347_v0 = vpop.permute.xlu0 %2346 }
 0xb89   : > { %4256 = vmatpush3.msra.mxu0 %v2347_v0 }
 0xb8a   : > { %4265 = vmatprep.subr.mxu0 %v4844_v36 }
 0xb92   : > { %v4542_v1 = vpop.eup %4541 }
 0xb93   : > { %v2343_v2 = vmul.f32 %v4542_v1, %v4538_v54 }
 0xb95   : > { %4258 = vmatmul.mubr.msk.f32.vlgmr.msra.gmra.mxu0 %vm999_vm2, %v2343_v2 }
 0xb96   : > { %4266 = vmatpush3.xpose.msk.msra.mxu0 %vm844_vm1, %v2501_v3  ;;  %4267 = vmatprep.mubr.msk.f32.mxu0 %vm4845_vm0, %v4844_v36 }
 0xb97   : > { %4275 = vmatprep.subr.mxu0 %v4844_v36 }
 0xbb9   : > { %v2341_v4 = vpop.xlane.xlu0 %2340 }
 0xbba   : > { %4543 = vrcp.f32 %v2341_v4 }
 0xbbd   : > { %v2499_v5 = vpop.permute.xlu0 %2498 }
 0xbbe   : > { %4268 = vmatmul.mubr.msk.f32.vlgmr.msra.gmra.mxu0 %vm844_vm1, %v2499_v5 }
 0xbbf   : > { %4277 = vmatprep.mubr.msk.f32.mxu0 %vm4845_vm0, %v4844_v36 }
 0xbc7   : > { %v4544_v6 = vpop.eup %4543 }
 0xbc8   : > { %v2345_v8 = vmul.f32 %v4544_v6, %v4540_v61 }
 0xbca   : > { %4263 = vmatmul.mubr.msk.f32.vlgmr.msra.gmra.mxu1 %vm999_vm2, %v2345_v8 }
 0xbcb   : > { %4271 = vmatpush3.xpose.msk.msra.mxu1 %vm844_vm1, %v2579_v7  ;;  %4272 = vmatprep.mubr.msk.f32.mxu1 %vm4845_vm0, %v4844_v36 }
 0xbcc   : > { %4280 = vmatprep.subr.mxu1 %v4844_v36 }
 0xbce   : > { %4273 = vmatmul.mubr.msk.f32.vlgmr.msra.gmra.mxu1 %vm844_vm1, %v2577_v10 }
 0xbcf   : > { %4282 = vmatprep.mubr.msk.f32.mxu1 %vm4845_vm0, %v4844_v36 }
 0xc55   : > { %v5424_v13 = vpop.f32.mrf.mxu0 }
 0xc57   : > { %v4259_v14 = vpop.f32.mrf.mxu0 }
 0xc7e   : > { %v2572_v15 = vpop.f32.mrf.mxu0 }
 0xc7f   : > { %v2654_v16 = vmul.f32 0.25, %v2572_v15 }
 0xc80   : > { %v4269_v17 = vpop.f32.mrf.mxu0 }
 0xc81   : > { %v2656_v18 = vsel %vm999_vm2, %v2654_v16, -inf }
 0xc82   : > { %2657 = vmax.xlane.f32.xlu0 %v2656_v18 }
 0xc8a   : > { %v5427_v19 = vpop.f32.mrf.mxu1 }
 0xc8b   : > { %v4485_v20 = vpack.i.bf16 %v5427_v19, %v5424_v13 }
 0xc8c   : > { %v4264_v22 = vpop.f32.mrf.mxu1 }
 0xc8e   : > { %v2650_v24 = vpop.f32.mrf.mxu1 }
 0xc8f   : > { %v2655_v25 = vmul.f32 0.25, %v2650_v24 }
 0xc90   : > { %v4274_v26 = vpop.f32.mrf.mxu1 }
 0xc91   : > { %v2659_v27 = vsel %vm999_vm2, %v2655_v25, -inf }
 0xc92   : > { %2660 = vmax.xlane.f32.xlu1 %v2659_v27 }
 0xca3   : > { %2754 = vrot.lane.b32.xlu1 %v5240_v21, %s4850_s1 }
 0xca7   : > { %2832 = vrot.lane.b32.xlu1 %v5200_v44, %s4851_s27 }
 0xcab   : > { %2910 = vrot.lane.b32.xlu1 %v5207_v45, %s4851_s27 }
 0xcaf   : > { %2908 = vrot.lane.b32.xlu1 %v5215_v46, %s4851_s27 }
 0xd0b   : > { %v2658_v28 = vpop.xlane.xlu0 %2657 }
 0xd0c   : > { %v2662_v29 = vsub.f32 %v2654_v16, %v2658_v28 }
 0xd0e   : > { %v2664_v30 = vmul.f32 1.442695, %v2662_v29 }
 0xd10   : > { %4545 = vpow2.f32 %v2664_v30 }
 0xd1b   : > { %v2661_v31 = vpop.xlane.xlu1 %2660 }
 0xd1c   : > { %v2663_v41 = vsub.f32 %v2655_v25, %v2661_v31 }
 0xd1d   : > { %v4546_v32 = vpop.eup %4545 }
 0xd1e   : > { %v2668_v35 = vsel %vm999_vm2, %v4546_v32, 0.0  ;;  %v2666_v42 = vmul.f32 1.442695, %v2663_v41 }
 0xd1f   : > { %2669 = vadd.xlane.f32.xlu0 %v2668_v35  ;;  %v2755_v40 = vpop.permute.xlu1 %2754 }
 0xd20   : > { %4281 = vmatpush3.msra.mxu1 %v2755_v40  ;;  %4547 = vpow2.f32 %v2666_v42 }
 0xd21   : > { %4290 = vmatprep.subr.mxu1 %v4844_v36 }
 0xd23   : > { %v2833_v54 = vpop.permute.xlu1 %2832 }
 0xd27   : > { %v2911_v60 = vpop.permute.xlu1 %2910 }
 0xd2b   : > { %v2909_v62 = vpop.permute.xlu1 %2908 }
 0xd2d   : > { %v4548_v47 = vpop.eup %4547 }
 0xd2e   : > { %v2671_v48 = vsel %vm999_vm2, %v4548_v47, 0.0 }
 0xd35   : > { %2678 = vrot.lane.b32.xlu0 %v5242_v23, %s4850_s1 }
 0xd54   : > { %2672 = vadd.xlane.f32.xlu0 %v2671_v48 }
 0xd6a   : > { %2830 = vrot.lane.b32.xlu0 %v5198_v43, %s4851_s27 }
 0xda8   : > { %v2670_v49 = vpop.xlane.xlu0 %2669 }
 0xda9   : > { %4549 = vrcp.f32 %v2670_v49 }
 0xdac   : > { %v2679_v50 = vpop.permute.xlu0 %2678 }
 0xdad   : > { %4276 = vmatpush3.msra.mxu0 %v2679_v50 }
 0xdae   : > { %4285 = vmatprep.subr.mxu0 %v4844_v36 }
 0xdb6   : > { %v4550_v51 = vpop.eup %4549 }
 0xdb7   : > { %v2675_v52 = vmul.f32 %v4550_v51, %v4546_v32 }
 0xdb9   : > { %4278 = vmatmul.mubr.msk.f32.vlgmr.msra.gmra.mxu0 %vm999_vm2, %v2675_v52 }
 0xdba   : > { %4286 = vmatpush3.xpose.msk.msra.mxu0 %vm844_vm1, %v2833_v54  ;;  %4287 = vmatprep.mubr.msk.f32.mxu0 %vm4845_vm0, %v4844_v36 }
 0xdbb   : > { %4295 = vmatprep.subr.mxu0 %v4844_v36 }
 0xddd   : > { %v2673_v57 = vpop.xlane.xlu0 %2672 }
 0xdde   : > { %4551 = vrcp.f32 %v2673_v57 }
 0xde1   : > { %v2831_v58 = vpop.permute.xlu0 %2830 }
 0xde2   : > { %4288 = vmatmul.mubr.msk.f32.vlgmr.msra.gmra.mxu0 %vm844_vm1, %v2831_v58 }
 0xde3   : > { %4297 = vmatprep.mubr.msk.f32.mxu0 %vm4845_vm0, %v4844_v36 }
 0xdeb   : > { %v4552_v59 = vpop.eup %4551 }
 0xdec   : > { %v2677_v61 = vmul.f32 %v4552_v59, %v4548_v47 }
 0xdee   : > { %4283 = vmatmul.mubr.msk.f32.vlgmr.msra.gmra.mxu1 %vm999_vm2, %v2677_v61 }
 0xdef   : > { %4291 = vmatpush3.xpose.msk.msra.mxu1 %vm844_vm1, %v2911_v60  ;;  %4292 = vmatprep.mubr.msk.f32.mxu1 %vm4845_vm0, %v4844_v36 }
 0xdf0   : > { %4300 = vmatprep.subr.mxu1 %v4844_v36 }
 0xdf2   : > { %4293 = vmatmul.mubr.msk.f32.vlgmr.msra.gmra.mxu1 %vm844_vm1, %v2909_v62 }
 0xdf3   : > { %4302 = vmatprep.mubr.msk.f32.mxu1 %vm4845_vm0, %v4844_v36 }
 0xe79   : > { %v5464_v63 = vpop.f32.mrf.mxu0 }
 0xe7b   : > { %v4279_v0 = vpop.f32.mrf.mxu0 }
 0xea2   : > { %v2904_v1 = vpop.f32.mrf.mxu0 }
 0xea3   : > { %v2986_v2 = vmul.f32 0.25, %v2904_v1 }
 0xea4   : > { %v4289_v3 = vpop.f32.mrf.mxu0 }
 0xea5   : > { %v2988_v4 = vsel %vm999_vm2, %v2986_v2, -inf }
 0xea6   : > { %2989 = vmax.xlane.f32.xlu0 %v2988_v4 }
 0xeae   : > { %v5467_v5 = vpop.f32.mrf.mxu1 }
 0xeaf   : > { %v4490_v6 = vpack.i.bf16 %v5467_v5, %v5464_v63  ;;  %v3582_v63 = vld [vmem:[#allocation13 + $0x60] sm:$0xff]  ;;  %v3581_v5 = vld [vmem:[#allocation13 + $0x58] sm:$0xff] }
 0xeb0   : > { %v4284_v7 = vpop.f32.mrf.mxu1 }
 0xeb2   : > { %v2982_v8 = vpop.f32.mrf.mxu1 }
 0xeb3   : > { %v2987_v10 = vmul.f32 0.25, %v2982_v8 }
 0xeb4   : > { %v4294_v14 = vpop.f32.mrf.mxu1 }
 0xeb5   : > { %v2991_v15 = vsel %vm999_vm2, %v2987_v10, -inf  ;;  %v3578_v14 = vld [vmem:[#allocation13 + $0x40] sm:$0xff] }
 0xeb6   : > { %2992 = vmax.xlane.f32.xlu1 %v2991_v15  ;;  %v3577_v15 = vld [vmem:[#allocation13 + $0x38] sm:$0xff] }
 0xec7   : > { %3086 = vrot.lane.b32.xlu1 %v5240_v21, %s4851_s27 }
 0xecb   : > { %3164 = vrot.lane.b32.xlu1 %v5200_v44, %s4852_s7 }
 0xecf   : > { %3242 = vrot.lane.b32.xlu1 %v5207_v45, %s4852_s7 }
 0xed3   : > { %3240 = vrot.lane.b32.xlu1 %v5215_v46, %s4852_s7 }
 0xf2f   : > { %v2990_v16 = vpop.xlane.xlu0 %2989 }
 0xf30   : > { %v2994_v17 = vsub.f32 %v2986_v2, %v2990_v16  ;;  %v3576_v16 = vld [vmem:[#allocation13 + $0x30] sm:$0xff] }
 0xf32   : > { %v2996_v18 = vmul.f32 1.442695, %v2994_v17  ;;  %v3575_v17 = vld [vmem:[#allocation13 + $0x28] sm:$0xff] }
 0xf34   : > { %4553 = vpow2.f32 %v2996_v18  ;;  %v3574_v18 = vld [vmem:[#allocation13 + $0x20] sm:$0xff] }
 0xf3f   : > { %v2993_v22 = vpop.xlane.xlu1 %2992 }
 0xf40   : > { %v2995_v44 = vsub.f32 %v2987_v10, %v2993_v22  ;;  %v3579_v10 = vld [vmem:[#allocation13 + $0x48] sm:$0xff]  ;;  %v3573_v22 = vld [vmem:[#allocation13 + $0x18] sm:$0xff] }
 0xf41   : > { %v4554_v24 = vpop.eup %4553 }
 0xf42   : > { %v3000_v25 = vsel %vm999_vm2, %v4554_v24, 0.0  ;;  %v2998_v45 = vmul.f32 1.442695, %v2995_v44  ;;  %v3570_v44 = vld [vmem:[#allocation13] sm:$0xff] }
 0xf43   : > { %3001 = vadd.xlane.f32.xlu0 %v3000_v25  ;;  %v3087_v26 = vpop.permute.xlu1 %3086 }
 0xf44   : > { %4301 = vmatpush3.msra.mxu1 %v3087_v26  ;;  %4555 = vpow2.f32 %v2998_v45  ;;  %v3571_v26 = vld [vmem:[#allocation13 + $0x8] sm:$0xff] }
 0xf45   : > { %4310 = vmatprep.subr.mxu1 %v4844_v36 }
 0xf47   : > { %v3165_v32 = vpop.permute.xlu1 %3164 }
 0xf4b   : > { %v3243_v41 = vpop.permute.xlu1 %3242 }
 0xf4f   : > { %v3241_v47 = vpop.permute.xlu1 %3240 }
 0xf51   : > { %v4556_v46 = vpop.eup %4555 }
 0xf52   : > { %v3003_v27 = vsel %vm999_vm2, %v4556_v46, 0.0 }
 0xf59   : > { %3010 = vrot.lane.b32.xlu0 %v5242_v23, %s4851_s27 }
 0xf78   : > { %3004 = vadd.xlane.f32.xlu0 %v3003_v27 }
 0xf8e   : > { %3162 = vrot.lane.b32.xlu0 %v5198_v43, %s4852_s7 }
 0xfcc   : > { %v3002_v28 = vpop.xlane.xlu0 %3001 }
 0xfcd   : > { %4557 = vrcp.f32 %v3002_v28 }
 0xfd0   : > { %v3011_v29 = vpop.permute.xlu0 %3010 }
 0xfd1   : > { %4296 = vmatpush3.msra.mxu0 %v3011_v29 }
 0xfd2   : > { %4305 = vmatprep.subr.mxu0 %v4844_v36 }
 0xfda   : > { %v4558_v30 = vpop.eup %4557 }
 0xfdb   : > { %v3007_v31 = vmul.f32 %v4558_v30, %v4554_v24  ;;  %v3572_v24 = vld [vmem:[#allocation13 + $0x10] sm:$0xff] }
 0xfdd   : > { %4298 = vmatmul.mubr.msk.f32.vlgmr.msra.gmra.mxu0 %vm999_vm2, %v3007_v31 }
 0xfde   : > { %4306 = vmatpush3.xpose.msk.msra.mxu0 %vm844_vm1, %v3165_v32  ;;  %4307 = vmatprep.mubr.msk.f32.mxu0 %vm4845_vm0, %v4844_v36 }
 0xfdf   : > { %4315 = vmatprep.subr.mxu0 %v4844_v36 }
0x1001   : > { %v3005_v35 = vpop.xlane.xlu0 %3004 }
0x1002   : > { %4559 = vrcp.f32 %v3005_v35 }
0x1005   : > { %v3163_v43 = vpop.permute.xlu0 %3162 }
0x1006   : > { %4308 = vmatmul.mubr.msk.f32.vlgmr.msra.gmra.mxu0 %vm844_vm1, %v3163_v43 }
0x1007   : > { %4317 = vmatprep.mubr.msk.f32.mxu0 %vm4845_vm0, %v4844_v36 }
0x100f   : > { %v4560_v40 = vpop.eup %4559 }
0x1010   : > { %v3009_v42 = vmul.f32 %v4560_v40, %v4556_v46 }
0x1012   : > { %4303 = vmatmul.mubr.msk.f32.vlgmr.msra.gmra.mxu1 %vm999_vm2, %v3009_v42 }
0x1013   : > { %4311 = vmatpush3.xpose.msk.msra.mxu1 %vm844_vm1, %v3243_v41  ;;  %4312 = vmatprep.mubr.msk.f32.mxu1 %vm4845_vm0, %v4844_v36 }
0x1014   : > { %4320 = vmatprep.subr.mxu1 %v4844_v36 }
0x1016   : > { %4313 = vmatmul.mubr.msk.f32.vlgmr.msra.gmra.mxu1 %vm844_vm1, %v3241_v47 }
0x1017   : > { %4322 = vmatprep.mubr.msk.f32.mxu1 %vm4845_vm0, %v4844_v36 }
0x109d   : > { %v3082_v48 = vpop.f32.mrf.mxu0 }
0x109f   : > { %v4299_v49 = vpop.f32.mrf.mxu0 }
0x10c6   : > { %v3236_v50 = vpop.f32.mrf.mxu0 }
0x10c7   : > { %v3318_v51 = vmul.f32 0.25, %v3236_v50 }
0x10c8   : > { %v4309_v52 = vpop.f32.mrf.mxu0 }
0x10c9   : > { %v3320_v54 = vsel %vm999_vm2, %v3318_v51, -inf }
0x10ca   : > { %3321 = vmax.xlane.f32.xlu0 %v3320_v54 }
0x10d2   : > { %v3158_v57 = vpop.f32.mrf.mxu1 }
0x10d3   : > { %v4495_v36 = vpack.i.bf16 %v3158_v57, %v3082_v48 }
0x10d4   : > { %v4304_v58 = vpop.f32.mrf.mxu1 }
0x10d6   : > { %v3314_v59 = vpop.f32.mrf.mxu1 }
0x10d7   : > { %v3319_v60 = vmul.f32 0.25, %v3314_v59 }
0x10d8   : > { %v4314_v61 = vpop.f32.mrf.mxu1 }
0x10d9   : > { %v3323_v62 = vsel %vm999_vm2, %v3319_v60, -inf }
0x10da   : > { %3324 = vmax.xlane.f32.xlu1 %v3323_v62 }
0x10eb   : > { %3418 = vrot.lane.b32.xlu1 %v5240_v21, %s4852_s7 }
0x10ef   : > { %4471 = vrot.lane.b32.xlu1 %v4470_v12, %s4852_s7 }
0x10f3   : > { %4476 = vrot.lane.b32.xlu1 %v4475_v56, %s4851_s27 }
0x10f7   : > { %4486 = vrot.lane.b32.xlu1 %v4485_v20, %s4849_s29 }
0x10fb   : > { %4496 = vrot.lane.b32.xlu1 %v4495_v36, %s4847_s13  ;;  %s4763_s13 = scalar_lea.vmem %s4762_s22, 512 }
0x10fc   : > { %p4765_p10 = scmp.lt.s32.totalorder %s4763_s13, %s4757_s16 }
0x10fe   : > { %p4766_p3 = por %p4765_p10, %p4764_p11 }
0x1100   : > { %p4767_p6 = pnand %p4766_p3, %p4760_p8 }
0x1153   : > { %v3322_v0 = vpop.xlane.xlu0 %3321 }
0x1154   : > { %v3326_v21 = vsub.f32 %v3318_v51, %v3322_v0 }
0x1156   : > { %v3328_v1 = vmul.f32 1.442695, %v3326_v21 }
0x1158   : > { %4561 = vpow2.f32 %v3328_v1 }
0x1163   : > { %v3325_v2 = vpop.xlane.xlu1 %3324 }
0x1164   : > { %v3327_v9 = vsub.f32 %v3319_v60, %v3325_v2 }
0x1165   : > { %v4562_v11 = vpop.eup %4561 }
0x1166   : > { %v3330_v12 = vmul.f32 1.442695, %v3327_v9  ;;  %v3332_v3 = vsel %vm999_vm2, %v4562_v11, 0.0 }
0x1167   : > { %3333 = vadd.xlane.f32.xlu0 %v3332_v3  ;;  %v3419_v53 = vpop.permute.xlu1 %3418 }
0x1168   : > { %4563 = vpow2.f32 %v3330_v12  ;;  %4321 = vmatpush3.msra.mxu1 %v3419_v53 }
0x116b   : > { %v4472_v29 = vpop.permute.xlu1 %4471 }
0x116c   : > { %v4474_v32 = vunpack.i.h.bf16 %v4472_v29  ;;  %v4473_v35 = vunpack.i.l.bf16 %v4472_v29 }
0x116e   : > { %v3551_v49 = vsel %vm844_vm1, %v5268_v37, %v4474_v32  ;;  %v3550_v50 = vsel %vm844_vm1, %v5266_v34, %v4473_v35 }
0x116f   : > { %v4477_v30 = vpop.permute.xlu1 %4476 }
0x1170   : > { %v4479_v43 = vunpack.i.h.bf16 %v4477_v30  ;;  %v4478_v40 = vunpack.i.l.bf16 %v4477_v30 }
0x1172   : > { %v3553_v51 = vsel %vm3552_vm3, %v3550_v50, %v4478_v40  ;;  %v3554_v52 = vsel %vm3552_vm3, %v3551_v49, %v4479_v43 }
0x1173   : > { %v4487_v41 = vpop.permute.xlu1 %4486 }
0x1174   : > { %v4489_v60 = vunpack.i.h.bf16 %v4487_v41  ;;  %v4488_v61 = vunpack.i.l.bf16 %v4487_v41 }
0x1175   : > { %v4564_v55 = vpop.eup %4563 }
0x1176   : > { %v3335_v56 = vsel %vm999_vm2, %v4564_v55, 0.0 }
0x1177   : > { %3336 = vadd.xlane.f32.xlu0 %v3335_v56  ;;  %v4497_v62 = vpop.permute.xlu1 %4496  ;;  %v3914_v56 = vld [vmem:[%s5603_s10] ss:$0 sm:$0xff] }
0x1178   : > { %v4499_v37 = vunpack.i.h.bf16 %v4497_v62  ;;  %v4498_v34 = vunpack.i.l.bf16 %v4497_v62 }
0x118d   : > { %3342 = vrot.lane.b32.xlu0 %v5242_v23, %s4852_s7 }
0x1191   : > { %4481 = vrot.lane.b32.xlu0 %v4480_v39, %s4850_s1  ;;  %v3583_v39 = vld [vmem:[#allocation13 + $0x68] sm:$0xff] }
0x1195   : > { %4491 = vrot.lane.b32.xlu0 %v4490_v6, %s4848_s30  ;;  %v3580_v6 = vld [vmem:[#allocation13 + $0x50] sm:$0xff] }
0x11f0   : > { %v3334_v13 = vpop.xlane.xlu0 %3333 }
0x11f1   : > { %4565 = vrcp.f32 %v3334_v13 }
0x11fe   : > { %v4566_v20 = vpop.eup %4565 }
0x11ff   : > { %v3339_v7 = vmul.f32 %v4566_v20, %v4562_v11 }
0x1200   : > { %v3337_v19 = vpop.xlane.xlu0 %3336 }
0x1201   : > { %4567 = vrcp.f32 %v3337_v19 }
0x1204   : > { %v3343_v4 = vpop.permute.xlu0 %3342 }
0x1205   : > { %4316 = vmatpush3.msra.mxu0 %v3343_v4 }
0x1206   : > { %4318 = vmatmul.mubr.msk.f32.vlgmr.msra.gmra.mxu0 %vm999_vm2, %v3339_v7  ;;  %4325 = vmatprep.subr.mxu0 %v3585_v33 }
0x1207   : > { %4326 = vmatpush3.msra.mxu0 %v3585_v33 }
0x1208   : > { %4327 = vmatprep.subr.mxu0 %v3584_v38  ;;  %v4482_v31 = vpop.permute.xlu0 %4481 }
0x1209   : > { %4328 = vmatpush3.msra.mxu0 %v3584_v38  ;;  %v4484_v42 = vunpack.i.h.bf16 %v4482_v31  ;;  %v4483_v47 = vunpack.i.l.bf16 %v4482_v31 }
0x120a   : > { %4329 = vmatprep.subr.mxu0 %v3583_v39 }
0x120b   : > { %4330 = vmatpush3.msra.mxu0 %v3583_v39  ;;  %v3556_v54 = vsel %vm3555_vm4, %v3553_v51, %v4483_v47  ;;  %v3557_v57 = vsel %vm3555_vm4, %v3554_v52, %v4484_v42 }
0x120c   : > { %4331 = vmatprep.subr.mxu0 %v3582_v63  ;;  %v4492_v48 = vpop.permute.xlu0 %4491  ;;  %v3560_v36 = vsel %vm3558_vm5, %v3557_v57, %v4489_v60  ;;  %v3559_v0 = vsel %vm3558_vm5, %v3556_v54, %v4488_v61 }
0x120d   : > { %4332 = vmatpush3.msra.mxu0 %v3582_v63  ;;  %v4494_v58 = vunpack.i.h.bf16 %v4492_v48  ;;  %v4493_v59 = vunpack.i.l.bf16 %v4492_v48 }
0x120e   : > { %v4568_v23 = vpop.eup %4567  ;;  %4333 = vmatprep.subr.mxu0 %v3581_v5 }
0x120f   : > { %v3341_v8 = vmul.f32 %v4568_v23, %v4564_v55  ;;  %4334 = vmatpush3.msra.mxu0 %v3581_v5  ;;  %v3563_v21 = vsel %vm3561_vm6, %v3560_v36, %v4494_v58  ;;  %v3562_v1 = vsel %vm3561_vm6, %v3559_v0, %v4493_v59 }
0x1210   : > { %4335 = vmatprep.subr.mxu0 %v3580_v6  ;;  %v3565_v12 = vsel %vm3564_vm7, %v3562_v1, %v4498_v34  ;;  %v3566_v3 = vsel %vm3564_vm7, %v3563_v21, %v4499_v37 }
0x1211   : > { %4323 = vmatmul.mubr.msk.f32.vlgmr.msra.gmra.mxu1 %vm999_vm2, %v3341_v8  ;;  %4336 = vmatpush3.msra.mxu0 %v3580_v6 }
0x1212   : > { %4337 = vmatprep.subr.mxu0 %v3579_v10 }
0x1213   : > { %4338 = vmatpush3.msra.mxu0 %v3579_v10 }
0x1214   : > { %4339 = vmatprep.subr.mxu0 %v3578_v14 }
0x1215   : > { %4340 = vmatpush3.msra.mxu0 %v3578_v14 }
0x1216   : > { %4341 = vmatprep.subr.mxu0 %v3577_v15 }
0x1217   : > { %4342 = vmatpush3.msra.mxu0 %v3577_v15 }
0x1218   : > { %4343 = vmatprep.subr.mxu0 %v3576_v16 }
0x1219   : > { %4344 = vmatpush3.msra.mxu0 %v3576_v16 }
0x121a   : > { %4345 = vmatprep.subr.mxu0 %v3575_v17 }
0x121b   : > { %4346 = vmatpush3.msra.mxu0 %v3575_v17 }
0x121c   : > { %4347 = vmatprep.subr.mxu0 %v3574_v18 }
0x121d   : > { %4348 = vmatpush3.msra.mxu0 %v3574_v18 }
0x121e   : > { %4349 = vmatprep.subr.mxu0 %v3573_v22 }
0x121f   : > { %4350 = vmatpush3.msra.mxu0 %v3573_v22 }
0x1220   : > { %4351 = vmatprep.subr.mxu0 %v3572_v24 }
0x1221   : > { %4352 = vmatpush3.msra.mxu0 %v3572_v24 }
0x1222   : > { %4353 = vmatprep.subr.mxu0 %v3571_v26 }
0x1223   : > { %4354 = vmatpush3.msra.mxu0 %v3571_v26 }
0x1224   : > { %4355 = vmatprep.subr.mxu0 %v3570_v44 }
0x1225   : > { %4356 = vmatpush3.msra.mxu0 %v3570_v44 }
0x12c6   : > { %v3414_v25 = vpop.f32.mrf.mxu0 }
0x12c8   : > { %v4319_v45 = vpop.f32.mrf.mxu0 }
0x12d1   : > { %v3490_v46 = vpop.f32.mrf.mxu1 }
0x12d2   : > { %v4500_v27 = vpack.i.bf16 %v3490_v46, %v3414_v25 }
0x12d3   : > { %v4324_v28 = vpop.f32.mrf.mxu1 }
0x12d4   : > { %4501 = vrot.lane.b32.xlu0 %v4500_v27, %s4846_s3  ;;  %s5550_s3 = scalar_lea.hbm %s5658_s12, %s3923_s23 }
0x1346   : > { %v4502_v2 = vpop.permute.xlu0 %4501 }
0x1347   : > { %v4504_v9 = vunpack.i.h.bf16 %v4502_v2  ;;  %v4503_v11 = vunpack.i.l.bf16 %v4502_v2 }
0x1349   : > { %v3568_v53 = vsel %vm3567_vm8, %v3565_v12, %v4503_v11  ;;  %v3569_v55 = vsel %vm3567_vm8, %v3566_v3, %v4504_v9 }
0x134a   : > { %4357 = vmatprep.mubr.f32.mxu0 %v3568_v53 }
0x134b   : > { %4358 = vmatmul.mubr.f32.vlgmr.msra.gmra.mxu0 %v3569_v55 }
0x140b   : > { %v4359_v13 = vpop.f32.mrf.mxu0 }
0x140c   : > { %v3665_v19 = vadd.f32 %v4359_v13, %v3914_v56 }
0x140d   : > { %v3659_v20 = vpop.f32.mrf.mxu0 }
0x140e   : > { %3669 = vst [vmem:[%s539_s11 + $0x8] sm:$0xff] %v3665_v19  ;;  %v3660_v4 = vadd.f32 %v3914_v56, %v3659_v20 }
0x1410   : > { %3668 = vst [vmem:[%s539_s11] sm:$0xff] %v3660_v4 }
0x1411   : > { %4770 = shalt.err (!%p4767_p6)
}
0x1412   : > { %s4771_s30 = scalar_lea.hbm %s5550_s3, 256  ;;  %s4775_s27 = scalar_lea.hbm %s5658_s12, 512 }
0x1413   : > { %p4772_p13 = scmp.ne.s32.totalorder %s5550_s3, %s4771_s30  ;;  %p4776_p2 = scmp.lt.s32.totalorder %s5550_s3, %s5658_s12 }
0x1414   : > { %p4777_p0 = scmp.lt.s32.totalorder %s4775_s27, %s4771_s30 }
0x1415   : > { %p4773_p7 = pnand %p4772_p13, %p5659_p5 }
0x1416   : > { %p4778_p1 = por %p4777_p0, %p4776_p2 }
0x1417   : > { %p4774_p9 = pneg %p4773_p7 }
0x1419   : > { %p4779_p12 = pnand %p4778_p1, %p4774_p9 }
0x141b   : > { %4782 = shalt.err (!%p4779_p12)
}
0x141c   : > { %s4854_s24 = smov 128   ;;  %s4855_s11 = smov 8  }
0x141d   : > { %4382 = dma.vmem_to_hbm [thread:$0]  (%p5659_p5), %s5545_s17, 256, %s5550_s3, %s3671_s26, %s4854_s24, %s4854_s24, %s4855_s11  }
0x141e PF: > { %s5660_s23 = sld [smem:[#allocation20_spill]] }
0x141f   : > { %s5661_s14 = sld [smem:[#allocation22_spill]] }
0x1420   : > { %s5662_s28 = sld [smem:[#allocation21_spill]] }
0x1424   : > { %s3699_s16 = sand.u32 1, %s5660_s23  }
0x1425   : > { %p5663_p4 = scmp.ne.s32.totalorder %s5661_s14, 0  ;;  %s3700_s21 = scalar_lea.sflag [#allocation4], %s3699_s16 }
0x1426   : > { %p5664_p8 = scmp.ge.s32.totalorder %s5662_s28, 2 }
0x1428   : > { %p4408_p11 = pnand %p5664_p8, %p5663_p4 }
0x142a   : > { %p4409_p10 = pneg %p4408_p11 }
0x142c   : > { %4816 = dma.done.wait (%p4409_p10), %s3700_s21, 256  }
0x142d   : > { %4818 = vsyncadd (%p4409_p10), %s3700_s21, 4294967040  ;;  %s5665_s20 = sld [smem:[#allocation23_spill]]  ;;  %s5667_s17 = smov %s4825_s18 }
0x142e   : > { %s5666_s22 = sld [smem:[#allocation25_spill]]  ;;  %s5668_s18 = smov %s4829_s19 }
0x1433   : > { %p29_p3 = scmp.ge.s32.totalorder %s5665_s20, 4  }
0x1434   : > { %s5669_s19 = smov %s5666_s22 }
0x1435   :  { %31 = sbr.rel (!%p29_p3) target bundleno = 14 (0xe), region = 149 }
0x143a   :  { %3705 = vsyncpa [#allocation3], 1 }
0x143b   :  { %3707 = vsyncpa [#allocation3 + $0x1], 1 }
0x143c   :  { %3708 = vsyncpa [#allocation6], 1 }
0x143d   :  { %3710 = vsyncpa [#allocation6 + $0x1], 1 }
0x143e   :  { %3711 = vsyncpa [#allocation9], 1 }
0x143f   :  { %3712 = vsyncpa [#allocation12], 1 }
0x1440   :  { %3713 = vsyncpa [#allocation4], 1 }
0x1441   :  { %3715 = vsyncpa [#allocation4 + $0x1], 1 }

</bundles_post_ra>
